<compile_context>
chip_gen: v7x
topology: tpu7x:2x2x1
jax: 0.10.0
libtpu: 0.0.40
codegen_flags: <defaults>
</compile_context>

<pallas_src>
import functools
import math

import numpy as np
import jax
import jax.numpy as jnp
from jax.experimental import pallas as pl
from jax.experimental.pallas import tpu as pltpu


# ---------------------------------------------------------------------------
# Fused kernel (one grid step = one (image, H-tile) pair)
# ---------------------------------------------------------------------------
def _fused_bottleneck_kernel(x_ref, halo_ref, w1_ref, b1_ref, w2_ref, b2_ref,
                             w3_ref, b3_ref, o_ref, y1p_ref, *, dil):
    _, th, W, Cin = x_ref.shape
    P = w1_ref.shape[1]                      # planes
    Cout = w3_ref.shape[1]                   # planes * expansion (== Cin)
    d = dil
    cdt = y1p_ref.dtype                      # compute dtype (bf16 or f32)

    t = pl.program_id(1)
    n_t = pl.num_programs(1)

    def conv1(x2d):                          # (rows*W, Cin) -> f32 (rows*W, P)
        y = jnp.dot(x2d, w1_ref[...], preferred_element_type=jnp.float32)
        return jnp.maximum(y + b1_ref[...], 0.0)

    # Zero the padded y1 scratch: column pads + (conditionally unused) halo
    # rows must be zero so conv2 sees its zero padding at image borders.
    y1p_ref[...] = jnp.zeros_like(y1p_ref)

    # ---- Stage 1: 1x1 conv + bn1 + relu on this tile's rows + halo rows ----
    x_main = x_ref[0]                                             # (th, W, Cin)
    y1_main = conv1(x_main.reshape(th * W, Cin))
    y1p_ref[d:d + th, d:d + W, :] = y1_main.reshape(th, W, P).astype(cdt)

    @pl.when(t > 0)                          # top halo rows exist
    def _():
        top = halo_ref[0, 0, 0:d].reshape(d * W, Cin)
        y1p_ref[0:d, d:d + W, :] = conv1(top).reshape(d, W, P).astype(cdt)

    @pl.when(t < n_t - 1)                    # bottom halo rows exist
    def _():
        bot = halo_ref[0, 0, d:2 * d].reshape(d * W, Cin)
        y1p_ref[d + th:2 * d + th, d:d + W, :] = (
            conv1(bot).reshape(d, W, P).astype(cdt))

    # ---- Stage 2: 3x3 dilated conv + bn2 + relu, ONE matmul with K = 9P ----
    # All slice starts are static; the 9 taps are lane-concatenated once so
    # the whole conv accumulates inside the MXU (no f32 acc round trips).
    taps = jnp.concatenate(
        [y1p_ref[kh * d:kh * d + th, kw * d:kw * d + W, :]
         for kh in range(3) for kw in range(3)], axis=-1)         # (th, W, 9P)
    y2 = jnp.dot(taps.reshape(th * W, 9 * P), w2_ref[...],
                 preferred_element_type=jnp.float32)
    y2 = jnp.maximum(y2 + b2_ref[...], 0.0)

    # ---- Stage 3: 1x1 conv + bn3 + residual add + relu --------------------
    y3 = jnp.dot(y2.astype(w3_ref.dtype), w3_ref[...],
                 preferred_element_type=jnp.float32)
    res = x_main.reshape(th * W, Cin).astype(jnp.float32)
    y3 = jnp.maximum(y3 + b3_ref[...] + res, 0.0)
    o_ref[0] = y3.reshape(th, W, Cout).astype(o_ref.dtype)


# ---------------------------------------------------------------------------
# Wrapper helpers
# ---------------------------------------------------------------------------
def _fold_bn(gamma, beta, mean, var, eps=1e-5):
    scale = gamma / jnp.sqrt(var + eps)
    shift = beta - mean * scale
    return scale, shift


def _pick_block_h(H, target, d):
    """Largest divisor of H that is <= max(target, d) and >= d (if possible)."""
    divs = [k for k in range(1, H + 1) if H % k == 0]
    ok = [k for k in divs if d <= k <= max(int(target), d)]
    if ok:
        return max(ok)
    ge = [k for k in divs if k >= d]
    return min(ge) if ge else H


def _nbytes(shape, dtype):
    return math.prod(shape) * np.dtype(dtype).itemsize


# ---------------------------------------------------------------------------
# NHWC-native entry point (no layout transposes)
# ---------------------------------------------------------------------------
def bottleneck_forward_nhwc(x_nhwc, params, dilation=1, *, block_h=32,
                            compute_dtype=jnp.bfloat16, out_dtype=jnp.float32):
    N, H, W, Cin = x_nhwc.shape
    d = int(dilation)
    assert d >= 1
    P = params["w1"].shape[1]
    Cout = params["w3"].shape[1]
    assert Cin == Cout, "stride=1 / downsample=None requires inplanes == planes*expansion"

    th = _pick_block_h(H, block_h, d)
    T = H // th
    assert T == 1 or th >= d, (th, d)

    # Fold BN scale into the conv weights once (f32), then cast for the MXU.
    s1, sh1 = _fold_bn(*params["bn1"])
    s2, sh2 = _fold_bn(*params["bn2"])
    s3, sh3 = _fold_bn(*params["bn3"])
    w1f = (params["w1"] * s1[None, :]).astype(compute_dtype)                   # (Cin, P)
    w2f = (params["w2"] * s2[None, None, None, :]).reshape(9 * P, P)           # (9P, P)
    w2f = w2f.astype(compute_dtype)
    w3f = (params["w3"] * s3[None, :]).astype(compute_dtype)                   # (P, Cout)
    b1 = sh1.reshape(1, P).astype(jnp.float32)
    b2 = sh2.reshape(1, P).astype(jnp.float32)
    b3 = sh3.reshape(1, Cout).astype(jnp.float32)

    x = x_nhwc.astype(compute_dtype)

    # Per-tile halo rows (d above + d below), gathered once here; rows outside
    # the image are zero and the kernel skips their conv1 (pl.when masks).
    xp = jnp.pad(x, ((0, 0), (d, d), (0, 0), (0, 0)))
    tops = jnp.stack([xp[:, t * th:t * th + d] for t in range(T)], axis=1)
    bots = jnp.stack([xp[:, (t + 1) * th + d:(t + 1) * th + 2 * d]
                      for t in range(T)], axis=1)
    halo = jnp.concatenate([tops, bots], axis=2)            # (N, T, 2d, W, Cin)

    # VMEM budget from the actual block / scratch sizes (+ generous margin).
    est = (2 * _nbytes((1, th, W, Cin), compute_dtype)
           + 2 * _nbytes((1, 1, 2 * d, W, Cin), compute_dtype)
           + 2 * _nbytes((1, th, W, Cout), out_dtype)
           + 2 * (_nbytes((Cin, P), compute_dtype)
                  + _nbytes((9 * P, P), compute_dtype)
                  + _nbytes((P, Cout), compute_dtype))
           + 6 * _nbytes((1, max(P, Cout)), jnp.float32)
           + _nbytes((th + 2 * d, W + 2 * d, P), compute_dtype))
    vmem_limit = int(min(100 * 2**20, max(32 * 2**20, 4 * est)))

    kernel = functools.partial(_fused_bottleneck_kernel, dil=d)

    out = pl.pallas_call(
        kernel,
        out_shape=jax.ShapeDtypeStruct((N, H, W, Cout), out_dtype),
        grid_spec=pltpu.PrefetchScalarGridSpec(
            num_scalar_prefetch=0,
            grid=(N, T),
            in_specs=[
                pl.BlockSpec((1, th, W, Cin), lambda n, t: (n, t, 0, 0)),
                pl.BlockSpec((1, 1, 2 * d, W, Cin), lambda n, t: (n, t, 0, 0, 0)),
                pl.BlockSpec((Cin, P), lambda n, t: (0, 0)),
                pl.BlockSpec((1, P), lambda n, t: (0, 0)),
                pl.BlockSpec((9 * P, P), lambda n, t: (0, 0)),
                pl.BlockSpec((1, P), lambda n, t: (0, 0)),
                pl.BlockSpec((P, Cout), lambda n, t: (0, 0)),
                pl.BlockSpec((1, Cout), lambda n, t: (0, 0)),
            ],
            out_specs=pl.BlockSpec((1, th, W, Cout), lambda n, t: (n, t, 0, 0)),
            scratch_shapes=[pltpu.VMEM((th + 2 * d, W + 2 * d, P),
                                       compute_dtype)],
        ),
        compiler_params=pltpu.CompilerParams(
            # No cross-tile state => both axes independent (v7x megacore can
            # shard the H-tile axis even for batch=1).
            dimension_semantics=("parallel", "parallel"),
            vmem_limit_bytes=vmem_limit),
    )(x, halo, w1f, b1, w2f, b2, w3f, b3)
    return out


# ---------------------------------------------------------------------------
# NCHW adapter (PyTorch-facing interface)
# ---------------------------------------------------------------------------
def bottleneck_forward(x_nchw, params, dilation=1, *, block_h=32,
                       compute_dtype=jnp.bfloat16, out_dtype=jnp.float32):
    x = jnp.transpose(x_nchw, (0, 2, 3, 1))                 # NCHW -> NHWC
    out = bottleneck_forward_nhwc(x, params, dilation, block_h=block_h,
                                  compute_dtype=compute_dtype,
                                  out_dtype=out_dtype)
    return jnp.transpose(out, (0, 3, 1, 2))                 # NHWC -> NCHW


# ---------------------------------------------------------------------------
# Pure-JAX reference (for correctness check)
# ---------------------------------------------------------------------------
def bottleneck_reference(x_nchw, params, dilation=1):
    x = jnp.transpose(x_nchw, (0, 2, 3, 1)).astype(jnp.float32)
    s1, b1 = _fold_bn(*params["bn1"])
    s2, b2 = _fold_bn(*params["bn2"])
    s3, b3 = _fold_bn(*params["bn3"])
    d = int(dilation)

    y = jnp.maximum(jnp.einsum("nhwc,cd->nhwd", x, params["w1"]) * s1 + b1, 0.0)
    y = jax.lax.conv_general_dilated(
        y, params["w2"], window_strides=(1, 1),
        padding=[(d, d), (d, d)], rhs_dilation=(d, d),
        dimension_numbers=("NHWC", "HWIO", "NHWC"))
    y = jnp.maximum(y * s2 + b2, 0.0)
    y = jnp.einsum("nhwc,cd->nhwd", y, params["w3"]) * s3 + b3
    y = jnp.maximum(y + x, 0.0)
    return jnp.transpose(y, (0, 3, 1, 2))


if __name__ == "__main__":
    # Small shapes consistent with the module: expansion=4, downsample=None,
    # stride=1  =>  inplanes == planes * 4.
    N, planes, H, W = 2, 4, 16, 16
    inplanes = planes * 4          # 16

    key = jax.random.PRNGKey(0)
    ks = jax.random.split(key, 16)

    params = {
        "w1": 0.1 * jax.random.normal(ks[0], (inplanes, planes), jnp.float32),
        "w2": 0.1 * jax.random.normal(ks[1], (3, 3, planes, planes), jnp.float32),
        "w3": 0.1 * jax.random.normal(ks[2], (planes, planes * 4), jnp.float32),
        "bn1": (1.0 + 0.1 * jax.random.normal(ks[3], (planes,), jnp.float32),
                0.1 * jax.random.normal(ks[4], (planes,), jnp.float32),
                0.1 * jax.random.normal(ks[5], (planes,), jnp.float32),
                1.0 + 0.1 * jax.random.uniform(ks[6], (planes,), jnp.float32)),
        "bn2": (1.0 + 0.1 * jax.random.normal(ks[7], (planes,), jnp.float32),
                0.1 * jax.random.normal(ks[8], (planes,), jnp.float32),
                0.1 * jax.random.normal(ks[9], (planes,), jnp.float32),
                1.0 + 0.1 * jax.random.uniform(ks[10], (planes,), jnp.float32)),
        "bn3": (1.0 + 0.1 * jax.random.normal(ks[11], (planes * 4,), jnp.float32),
                0.1 * jax.random.normal(ks[12], (planes * 4,), jnp.float32),
                0.1 * jax.random.normal(ks[13], (planes * 4,), jnp.float32),
                1.0 + 0.1 * jax.random.uniform(ks[14], (planes * 4,), jnp.float32)),
    }

    x = jax.random.normal(ks[15], (N, inplanes, H, W), jnp.float32)

    # f32 compute path — tight tolerance.  Exercises the halo-recompute path:
    # block_h=8 -> 2 H-tiles, block_h=4 with dilation=2 -> interior tiles with
    # both top and bottom halos.
    for dil, bh in ((1, 8), (2, 8), (2, 4)):
        out = jax.block_until_ready(
            bottleneck_forward(x, params, dilation=dil, block_h=bh,
                               compute_dtype=jnp.float32))
        ref = jax.block_until_ready(bottleneck_reference(x, params, dilation=dil))
        assert out.shape == (N, inplanes, H, W)
        err = float(jnp.max(jnp.abs(out - ref)))
        assert jnp.allclose(out, ref, atol=1e-3, rtol=1e-3), (dil, bh, err)

    # Default bf16 MXU-operand path (f32 accumulation) — looser tolerance.
    out_bf16 = jax.block_until_ready(
        bottleneck_forward(x, params, dilation=1, block_h=8))
    ref = bottleneck_reference(x, params, dilation=1)
    err_bf16 = float(jnp.max(jnp.abs(out_bf16 - ref)))
    assert err_bf16 < 0.1, err_bf16

    print("KERNEL_OK")
</pallas_src>

<mosaic_0001>
module attributes {stable_mosaic.version = 11 : i64} {
  func.func @_fused_bottleneck_kernel(%arg0: i32, %arg1: i32, %arg2: memref<1x8x16x16xf32, #tpu.memory_space<vmem>>, %arg3: memref<1x1x2x16x16xf32, #tpu.memory_space<vmem>>, %arg4: memref<16x4xf32, #tpu.memory_space<vmem>>, %arg5: memref<1x4xf32, #tpu.memory_space<vmem>>, %arg6: memref<36x4xf32, #tpu.memory_space<vmem>>, %arg7: memref<1x4xf32, #tpu.memory_space<vmem>>, %arg8: memref<4x16xf32, #tpu.memory_space<vmem>>, %arg9: memref<1x16xf32, #tpu.memory_space<vmem>>, %arg10: memref<1x8x16x16xf32, #tpu.memory_space<vmem>>, %arg11: memref<10x18x4xf32, #tpu.memory_space<vmem>>) attributes {dimension_semantics = [#tpu.dimension_semantics<parallel>, #tpu.dimension_semantics<parallel>], iteration_bounds = array<i64: 2, 2>, scalar_prefetch = 0 : i64, scratch_operands = 1 : i64, tpu.core_type = #tpu.core_type<tc>, window_params = [{transform_indices = @transform_0, window_bounds = array<i64: 1, 8, 16, 16>}, {transform_indices = @transform_1, window_bounds = array<i64: 1, 1, 2, 16, 16>}, {pipeline_mode = #tpu.pipeline_mode<synchronous>, transform_indices = @transform_2, window_bounds = array<i64: 16, 4>}, {pipeline_mode = #tpu.pipeline_mode<synchronous>, transform_indices = @transform_3, window_bounds = array<i64: 1, 4>}, {pipeline_mode = #tpu.pipeline_mode<synchronous>, transform_indices = @transform_4, window_bounds = array<i64: 36, 4>}, {pipeline_mode = #tpu.pipeline_mode<synchronous>, transform_indices = @transform_5, window_bounds = array<i64: 1, 4>}, {pipeline_mode = #tpu.pipeline_mode<synchronous>, transform_indices = @transform_6, window_bounds = array<i64: 4, 16>}, {pipeline_mode = #tpu.pipeline_mode<synchronous>, transform_indices = @transform_7, window_bounds = array<i64: 1, 16>}, {transform_indices = @transform_8, window_bounds = array<i64: 1, 8, 16, 16>}]} {
    %cst = arith.constant 0.000000e+00 : f32
    %0 = vector.broadcast %cst : f32 to vector<10x18x4xf32>
    %c0 = arith.constant 0 : index
    %c0_0 = arith.constant 0 : index
    %c0_1 = arith.constant 0 : index
    %1 = vector.load %arg11[%c0, %c0_0, %c0_1] : memref<10x18x4xf32, #tpu.memory_space<vmem>>, vector<10x18x4xf32>
    tpu.vector_store %arg11[%c0, %c0_0, %c0_1], %0 {strides = array<i32>} : memref<10x18x4xf32, #tpu.memory_space<vmem>>, vector<10x18x4xf32>,
    %c0_2 = arith.constant 0 : index
    %c0_3 = arith.constant 0 : index
    %c0_4 = arith.constant 0 : index
    %c0_5 = arith.constant 0 : index
    %2 = vector.load %arg2[%c0_2, %c0_3, %c0_4, %c0_5] : memref<1x8x16x16xf32, #tpu.memory_space<vmem>>, vector<1x8x16x16xf32>
    %3 = vector.shape_cast %2 : vector<1x8x16x16xf32> to vector<8x16x16xf32>
    %4 = vector.shape_cast %3 : vector<8x16x16xf32> to vector<128x16xf32>
    %c0_6 = arith.constant 0 : index
    %c0_7 = arith.constant 0 : index
    %5 = vector.load %arg4[%c0_6, %c0_7] : memref<16x4xf32, #tpu.memory_space<vmem>>, vector<16x4xf32>
    %cst_8 = arith.constant dense<0.000000e+00> : vector<128x4xf32>
    %6 = tpu.matmul %4, %5, %cst_8 {dimension_numbers = #tpu.dot_dimension_numbers<[1], [0], [0], [1], [0, 0, 1, 1], [], []>} : vector<128x16xf32>, vector<16x4xf32>, vector<128x4xf32> -> vector<128x4xf32>
    %c0_9 = arith.constant 0 : index
    %c0_10 = arith.constant 0 : index
    %7 = vector.load %arg5[%c0_9, %c0_10] : memref<1x4xf32, #tpu.memory_space<vmem>>, vector<1x4xf32>
    %8 = vector.broadcast %7 : vector<1x4xf32> to vector<128x4xf32>
    %9 = arith.addf %6, %8 : vector<128x4xf32>
    %cst_11 = arith.constant 0.000000e+00 : f32
    %10 = vector.broadcast %cst_11 : f32 to vector<128x4xf32>
    %11 = arith.maximumf %9, %10 : vector<128x4xf32>
    %12 = vector.shape_cast %11 : vector<128x4xf32> to vector<8x16x4xf32>
    %c1 = arith.constant 1 : index
    %c1_12 = arith.constant 1 : index
    %c0_13 = arith.constant 0 : index
    %13 = vector.load %arg11[%c1, %c1_12, %c0_13] : memref<10x18x4xf32, #tpu.memory_space<vmem>>, vector<8x16x4xf32>
    tpu.vector_store %arg11[%c1, %c1_12, %c0_13], %12 {strides = array<i32>} : memref<10x18x4xf32, #tpu.memory_space<vmem>>, vector<8x16x4xf32>,
    %c0_i32 = arith.constant 0 : i32
    %14 = arith.cmpi sgt, %arg1, %c0_i32 : i32
    %15 = arith.extui %14 : i1 to i32
    %c0_i32_14 = arith.constant 0 : i32
    %16 = arith.cmpi ne, %15, %c0_i32_14 : i32
    scf.if %16 {
      %c0_58 = arith.constant 0 : index
      %c0_59 = arith.constant 0 : index
      %c0_60 = arith.constant 0 : index
      %c0_61 = arith.constant 0 : index
      %c0_62 = arith.constant 0 : index
      %51 = vector.load %arg3[%c0_58, %c0_59, %c0_60, %c0_61, %c0_62] : memref<1x1x2x16x16xf32, #tpu.memory_space<vmem>>, vector<1x1x1x16x16xf32>
      %52 = vector.shape_cast %51 : vector<1x1x1x16x16xf32> to vector<1x16x16xf32>
      %53 = vector.shape_cast %52 : vector<1x16x16xf32> to vector<16x16xf32>
      %c0_63 = arith.constant 0 : index
      %c0_64 = arith.constant 0 : index
      %54 = vector.load %arg4[%c0_63, %c0_64] : memref<16x4xf32, #tpu.memory_space<vmem>>, vector<16x4xf32>
      %cst_65 = arith.constant dense<0.000000e+00> : vector<16x4xf32>
      %55 = tpu.matmul %53, %54, %cst_65 {dimension_numbers = #tpu.dot_dimension_numbers<[1], [0], [0], [1], [0, 0, 1, 1], [], []>} : vector<16x16xf32>, vector<16x4xf32>, vector<16x4xf32> -> vector<16x4xf32>
      %c0_66 = arith.constant 0 : index
      %c0_67 = arith.constant 0 : index
      %56 = vector.load %arg5[%c0_66, %c0_67] : memref<1x4xf32, #tpu.memory_space<vmem>>, vector<1x4xf32>
      %57 = vector.broadcast %56 : vector<1x4xf32> to vector<16x4xf32>
      %58 = arith.addf %55, %57 : vector<16x4xf32>
      %cst_68 = arith.constant 0.000000e+00 : f32
      %59 = vector.broadcast %cst_68 : f32 to vector<16x4xf32>
      %60 = arith.maximumf %58, %59 : vector<16x4xf32>
      %61 = vector.shape_cast %60 : vector<16x4xf32> to vector<1x16x4xf32>
      %c0_69 = arith.constant 0 : index
      %c1_70 = arith.constant 1 : index
      %c0_71 = arith.constant 0 : index
      %62 = vector.load %arg11[%c0_69, %c1_70, %c0_71] : memref<10x18x4xf32, #tpu.memory_space<vmem>>, vector<1x16x4xf32>
      tpu.vector_store %arg11[%c0_69, %c1_70, %c0_71], %61 {strides = array<i32>} : memref<10x18x4xf32, #tpu.memory_space<vmem>>, vector<1x16x4xf32>,
    } else {
    }
    %c1_i32 = arith.constant 1 : i32
    %17 = arith.cmpi slt, %arg1, %c1_i32 : i32
    %18 = arith.extui %17 : i1 to i32
    %c0_i32_15 = arith.constant 0 : i32
    %19 = arith.cmpi ne, %18, %c0_i32_15 : i32
    scf.if %19 {
      %c0_58 = arith.constant 0 : index
      %c0_59 = arith.constant 0 : index
      %c1_60 = arith.constant 1 : index
      %c0_61 = arith.constant 0 : index
      %c0_62 = arith.constant 0 : index
      %51 = vector.load %arg3[%c0_58, %c0_59, %c1_60, %c0_61, %c0_62] : memref<1x1x2x16x16xf32, #tpu.memory_space<vmem>>, vector<1x1x1x16x16xf32>
      %52 = vector.shape_cast %51 : vector<1x1x1x16x16xf32> to vector<1x16x16xf32>
      %53 = vector.shape_cast %52 : vector<1x16x16xf32> to vector<16x16xf32>
      %c0_63 = arith.constant 0 : index
      %c0_64 = arith.constant 0 : index
      %54 = vector.load %arg4[%c0_63, %c0_64] : memref<16x4xf32, #tpu.memory_space<vmem>>, vector<16x4xf32>
      %cst_65 = arith.constant dense<0.000000e+00> : vector<16x4xf32>
      %55 = tpu.matmul %53, %54, %cst_65 {dimension_numbers = #tpu.dot_dimension_numbers<[1], [0], [0], [1], [0, 0, 1, 1], [], []>} : vector<16x16xf32>, vector<16x4xf32>, vector<16x4xf32> -> vector<16x4xf32>
      %c0_66 = arith.constant 0 : index
      %c0_67 = arith.constant 0 : index
      %56 = vector.load %arg5[%c0_66, %c0_67] : memref<1x4xf32, #tpu.memory_space<vmem>>, vector<1x4xf32>
      %57 = vector.broadcast %56 : vector<1x4xf32> to vector<16x4xf32>
      %58 = arith.addf %55, %57 : vector<16x4xf32>
      %cst_68 = arith.constant 0.000000e+00 : f32
      %59 = vector.broadcast %cst_68 : f32 to vector<16x4xf32>
      %60 = arith.maximumf %58, %59 : vector<16x4xf32>
      %61 = vector.shape_cast %60 : vector<16x4xf32> to vector<1x16x4xf32>
      %c9 = arith.constant 9 : index
      %c1_69 = arith.constant 1 : index
      %c0_70 = arith.constant 0 : index
      %62 = vector.load %arg11[%c9, %c1_69, %c0_70] : memref<10x18x4xf32, #tpu.memory_space<vmem>>, vector<1x16x4xf32>
      tpu.vector_store %arg11[%c9, %c1_69, %c0_70], %61 {strides = array<i32>} : memref<10x18x4xf32, #tpu.memory_space<vmem>>, vector<1x16x4xf32>,
    } else {
    }
    %c0_16 = arith.constant 0 : index
    %c0_17 = arith.constant 0 : index
    %c0_18 = arith.constant 0 : index
    %20 = vector.load %arg11[%c0_16, %c0_17, %c0_18] : memref<10x18x4xf32, #tpu.memory_space<vmem>>, vector<8x16x4xf32>
    %c0_19 = arith.constant 0 : index
    %c1_20 = arith.constant 1 : index
    %c0_21 = arith.constant 0 : index
    %21 = vector.load %arg11[%c0_19, %c1_20, %c0_21] : memref<10x18x4xf32, #tpu.memory_space<vmem>>, vector<8x16x4xf32>
    %c0_22 = arith.constant 0 : index
    %c2 = arith.constant 2 : index
    %c0_23 = arith.constant 0 : index
    %22 = vector.load %arg11[%c0_22, %c2, %c0_23] : memref<10x18x4xf32, #tpu.memory_space<vmem>>, vector<8x16x4xf32>
    %c1_24 = arith.constant 1 : index
    %c0_25 = arith.constant 0 : index
    %c0_26 = arith.constant 0 : index
    %23 = vector.load %arg11[%c1_24, %c0_25, %c0_26] : memref<10x18x4xf32, #tpu.memory_space<vmem>>, vector<8x16x4xf32>
    %c1_27 = arith.constant 1 : index
    %c1_28 = arith.constant 1 : index
    %c0_29 = arith.constant 0 : index
    %24 = vector.load %arg11[%c1_27, %c1_28, %c0_29] : memref<10x18x4xf32, #tpu.memory_space<vmem>>, vector<8x16x4xf32>
    %c1_30 = arith.constant 1 : index
    %c2_31 = arith.constant 2 : index
    %c0_32 = arith.constant 0 : index
    %25 = vector.load %arg11[%c1_30, %c2_31, %c0_32] : memref<10x18x4xf32, #tpu.memory_space<vmem>>, vector<8x16x4xf32>
    %c2_33 = arith.constant 2 : index
    %c0_34 = arith.constant 0 : index
    %c0_35 = arith.constant 0 : index
    %26 = vector.load %arg11[%c2_33, %c0_34, %c0_35] : memref<10x18x4xf32, #tpu.memory_space<vmem>>, vector<8x16x4xf32>
    %c2_36 = arith.constant 2 : index
    %c1_37 = arith.constant 1 : index
    %c0_38 = arith.constant 0 : index
    %27 = vector.load %arg11[%c2_36, %c1_37, %c0_38] : memref<10x18x4xf32, #tpu.memory_space<vmem>>, vector<8x16x4xf32>
    %c2_39 = arith.constant 2 : index
    %c2_40 = arith.constant 2 : index
    %c0_41 = arith.constant 0 : index
    %28 = vector.load %arg11[%c2_39, %c2_40, %c0_41] : memref<10x18x4xf32, #tpu.memory_space<vmem>>, vector<8x16x4xf32>
    %29 = tpu.concatenate %20, %21, %22, %23, %24, %25, %26, %27, %28 in 2 : vector<8x16x4xf32>, vector<8x16x4xf32>, vector<8x16x4xf32>, vector<8x16x4xf32>, vector<8x16x4xf32>, vector<8x16x4xf32>, vector<8x16x4xf32>, vector<8x16x4xf32>, vector<8x16x4xf32> -> vector<8x16x36xf32>
    %30 = vector.shape_cast %29 : vector<8x16x36xf32> to vector<128x36xf32>
    %c0_42 = arith.constant 0 : index
    %c0_43 = arith.constant 0 : index
    %31 = vector.load %arg6[%c0_42, %c0_43] : memref<36x4xf32, #tpu.memory_space<vmem>>, vector<36x4xf32>
    %cst_44 = arith.constant dense<0.000000e+00> : vector<128x4xf32>
    %32 = tpu.matmul %30, %31, %cst_44 {dimension_numbers = #tpu.dot_dimension_numbers<[1], [0], [0], [1], [0, 0, 1, 1], [], []>} : vector<128x36xf32>, vector<36x4xf32>, vector<128x4xf32> -> vector<128x4xf32>
    %c0_45 = arith.constant 0 : index
    %c0_46 = arith.constant 0 : index
    %33 = vector.load %arg7[%c0_45, %c0_46] : memref<1x4xf32, #tpu.memory_space<vmem>>, vector<1x4xf32>
    %34 = vector.broadcast %33 : vector<1x4xf32> to vector<128x4xf32>
    %35 = arith.addf %32, %34 : vector<128x4xf32>
    %cst_47 = arith.constant 0.000000e+00 : f32
    %36 = vector.broadcast %cst_47 : f32 to vector<128x4xf32>
    %37 = arith.maximumf %35, %36 : vector<128x4xf32>
    %c0_48 = arith.constant 0 : index
    %c0_49 = arith.constant 0 : index
    %38 = vector.load %arg8[%c0_48, %c0_49] : memref<4x16xf32, #tpu.memory_space<vmem>>, vector<4x16xf32>
    %cst_50 = arith.constant dense<0.000000e+00> : vector<128x16xf32>
    %39 = tpu.matmul %37, %38, %cst_50 {dimension_numbers = #tpu.dot_dimension_numbers<[1], [0], [0], [1], [0, 0, 1, 1], [], []>} : vector<128x4xf32>, vector<4x16xf32>, vector<128x16xf32> -> vector<128x16xf32>
    %40 = vector.shape_cast %3 : vector<8x16x16xf32> to vector<128x16xf32>
    %c0_51 = arith.constant 0 : index
    %c0_52 = arith.constant 0 : index
    %41 = vector.load %arg9[%c0_51, %c0_52] : memref<1x16xf32, #tpu.memory_space<vmem>>, vector<1x16xf32>
    %42 = vector.broadcast %41 : vector<1x16xf32> to vector<128x16xf32>
    %43 = arith.addf %39, %42 : vector<128x16xf32>
    %44 = arith.addf %43, %40 : vector<128x16xf32>
    %cst_53 = arith.constant 0.000000e+00 : f32
    %45 = vector.broadcast %cst_53 : f32 to vector<128x16xf32>
    %46 = arith.maximumf %44, %45 : vector<128x16xf32>
    %47 = vector.shape_cast %46 : vector<128x16xf32> to vector<8x16x16xf32>
    %c0_54 = arith.constant 0 : index
    %c0_55 = arith.constant 0 : index
    %c0_56 = arith.constant 0 : index
    %c0_57 = arith.constant 0 : index
    %48 = vector.load %arg10[%c0_54, %c0_55, %c0_56, %c0_57] : memref<1x8x16x16xf32, #tpu.memory_space<vmem>>, vector<1x8x16x16xf32>
    %49 = vector.shape_cast %48 : vector<1x8x16x16xf32> to vector<8x16x16xf32>
    %50 = vector.shape_cast %47 : vector<8x16x16xf32> to vector<1x8x16x16xf32>
    tpu.vector_store %arg10[%c0_54, %c0_55, %c0_56, %c0_57], %50 {strides = array<i32>} : memref<1x8x16x16xf32, #tpu.memory_space<vmem>>, vector<1x8x16x16xf32>,
    return
  }
  func.func @transform_0(%arg0: i32, %arg1: i32) -> (i32, i32, i32, i32) {
    %c0_i32 = arith.constant 0 : i32
    %c0_i32_0 = arith.constant 0 : i32
    %c0_i32_1 = arith.constant 0 : i32
    return %arg0, %arg1, %c0_i32, %c0_i32_0 : i32, i32, i32, i32
  }
  func.func @transform_1(%arg0: i32, %arg1: i32) -> (i32, i32, i32, i32, i32) {
    %c0_i32 = arith.constant 0 : i32
    %c0_i32_0 = arith.constant 0 : i32
    %c0_i32_1 = arith.constant 0 : i32
    %c0_i32_2 = arith.constant 0 : i32
    return %arg0, %arg1, %c0_i32, %c0_i32_0, %c0_i32_1 : i32, i32, i32, i32, i32
  }
  func.func @transform_2(%arg0: i32, %arg1: i32) -> (i32, i32) {
    %c0_i32 = arith.constant 0 : i32
    %c0_i32_0 = arith.constant 0 : i32
    %c0_i32_1 = arith.constant 0 : i32
    return %c0_i32, %c0_i32_0 : i32, i32
  }
  func.func @transform_3(%arg0: i32, %arg1: i32) -> (i32, i32) {
    %c0_i32 = arith.constant 0 : i32
    %c0_i32_0 = arith.constant 0 : i32
    %c0_i32_1 = arith.constant 0 : i32
    return %c0_i32, %c0_i32_0 : i32, i32
  }
  func.func @transform_4(%arg0: i32, %arg1: i32) -> (i32, i32) {
    %c0_i32 = arith.constant 0 : i32
    %c0_i32_0 = arith.constant 0 : i32
    %c0_i32_1 = arith.constant 0 : i32
    return %c0_i32, %c0_i32_0 : i32, i32
  }
  func.func @transform_5(%arg0: i32, %arg1: i32) -> (i32, i32) {
    %c0_i32 = arith.constant 0 : i32
    %c0_i32_0 = arith.constant 0 : i32
    %c0_i32_1 = arith.constant 0 : i32
    return %c0_i32, %c0_i32_0 : i32, i32
  }
  func.func @transform_6(%arg0: i32, %arg1: i32) -> (i32, i32) {
    %c0_i32 = arith.constant 0 : i32
    %c0_i32_0 = arith.constant 0 : i32
    %c0_i32_1 = arith.constant 0 : i32
    return %c0_i32, %c0_i32_0 : i32, i32
  }
  func.func @transform_7(%arg0: i32, %arg1: i32) -> (i32, i32) {
    %c0_i32 = arith.constant 0 : i32
    %c0_i32_0 = arith.constant 0 : i32
    %c0_i32_1 = arith.constant 0 : i32
    return %c0_i32, %c0_i32_0 : i32, i32
  }
  func.func @transform_8(%arg0: i32, %arg1: i32) -> (i32, i32, i32, i32) {
    %c0_i32 = arith.constant 0 : i32
    %c0_i32_0 = arith.constant 0 : i32
    %c0_i32_1 = arith.constant 0 : i32
    return %arg0, %arg1, %c0_i32, %c0_i32_0 : i32, i32, i32, i32
  }
}

</mosaic_0001>

<bundles_post_ra>
// kernel: tpu_custom_call.1
= control target key start
LH: loop header
LB: loop body
LE: loop exit
PB: predicated region body
PF: predicated region fallthrough
CT: control target
= control target key end

     0   :  { %s3832_s0 = inlined_call_operand.hbm [shape: f32[2,16,16,16], index: 0, kind: input, shape index: {}]   ;;  %s3833_s1 = inlined_call_operand.hbm [shape: f32[2,2,2,16,16], index: 1, kind: input, shape index: {}]   ;;  %s3834_s2 = inlined_call_operand.vmem [shape: f32[16,4], index: 2, kind: input, shape index: {}]   ;;  %s3835_s3 = inlined_call_operand.vmem [shape: f32[1,4], index: 3, kind: input, shape index: {}]   ;;  %s3836_s4 = inlined_call_operand.vmem [shape: f32[36,4], index: 4, kind: input, shape index: {}]   ;;  %s3837_s5 = inlined_call_operand.vmem [shape: f32[1,4], index: 5, kind: input, shape index: {}]   ;;  %s3838_s6 = inlined_call_operand.vmem [shape: f32[4,16], index: 6, kind: input, shape index: {}]   ;;  %s3839_s7 = inlined_call_operand.vmem [shape: f32[1,16], index: 7, kind: input, shape index: {}]   ;;  %s3840_s8 = inlined_call_operand.hbm [shape: f32[2,16,16,16], index: 8, kind: output, shape index: {}]  }
   0x1   :  { %3851 = sst [smem:[#allocation19_spill]] %s3832_s0 }
   0x2   :  { %3852 = sst [smem:[#allocation20_spill]] %s3840_s8 }
   0x3   :  { %13 = vsyncpa [#allocation4], 0 }
   0x4   :  { %15 = vsyncpa [#allocation4 + $0x1], 0 }
   0x5   :  { %16 = vsyncpa [#allocation7], 0 }
   0x6   :  { %18 = vsyncpa [#allocation7 + $0x1], 0 }
   0x7   :  { %19 = vsyncpa [#allocation5], 0 }
   0x8   :  { %21 = vsyncpa [#allocation5 + $0x1], 0  ;;  %s2873_s27 = smov 0   ;;  %s2875_s28 = smov 0  }
   0x9   :  { %s2877_s29 = smov 0   ;;  %s2879_s30 = smov 0  }
   0xa   :  { %s2881_s9 = smov 0   ;;  %s2883_s10 = smov 0  }
   0xb   :  { %s2885_s11 = smov 0   ;;  %s2887_s12 = smov 0  }
   0xc LB: > { %3853 = sst [smem:[#allocation12_spill]] %s2783_s27  ;;  %s2277_s13 = sadd.s32 4294967295, %s2811_s12   ;;  %s2811_s12 = sphi %s2887_s12, %s27_s12   ;;  %s2807_s11 = sphi %s2885_s11, %s3883_s11   ;;  %s2803_s10 = sphi %s2883_s10, %s3882_s10   ;;  %s2799_s9 = sphi %s2881_s9, %s3881_s9   ;;  %s2795_s30 = sphi %s2879_s30, %s3880_s30   ;;  %s2791_s29 = sphi %s2877_s29, %s3875_s29   ;;  %s2787_s28 = sphi %s2875_s28, %s3879_s28   ;;  %s2783_s27 = sphi %s2873_s27, %s3878_s27  }
   0xd   : > { %3854 = sst [smem:[#allocation13_spill]] %s2791_s29  ;;  %s2278_s14 = sadd.s32 4294967294, %s2811_s12  }
   0xe   : > { %s36_s15 = sadd.s32 1, %s2803_s10  ;;  %s39_s16 = sadd.s32 1, %s2807_s11 }
   0xf   : > { %p37_p0 = scmp.ge.s32.totalorder %s36_s15, 2  ;;  %s48_s17 = sadd.s32 1, %s2791_s29 }
  0x10   : > { %p55_p1 = scmp.ne.s32.totalorder %s2791_s29, %s2787_s28  ;;  %p56_p2 = scmp.eq.s32.totalorder %s2811_s12, 0 }
  0x11   : > { %s3885_s15 = smov (%p37_p0, %s36_s15), 0  ;;  %s3887_s16 = smov (!%p37_p0, %s39_s16), %s2807_s11 }
  0x12   : > { %3855 = sst [smem:[#allocation14_spill]] %s3885_s15  ;;  %s44_s18 = ssub.s32 %s2803_s10, %s3885_s15 }
  0x13   : > { %p2926_p3 = por %p56_p2, %p55_p1  ;;  %p41_p4 = scmp.ge.s32.totalorder %s3887_s16, 2 }
  0x14   : > { %p61_p5 = scmp.ne.s32.totalorder %s2787_s28, %s2783_s27  ;;  %p62_p6 = scmp.eq.s32.totalorder %s2277_s13, 0 }
  0x15   : > { %p241_p7 = scmp.eq.s32.totalorder %s2277_s13, 3  ;;  %s3889_s16 = smov (%p41_p4, %s3887_s16), 0 }
  0x16   : > { %3857 = sst [smem:[#allocation15_spill]] %s3889_s16  ;;  %p2934_p8 = por %p62_p6, %p61_p5 }
  0x17   : > { %p2938_p9 = por %p241_p7, %p55_p1  ;;  %s43_s22 = ssub.s32 %s2807_s11, %s3889_s16 }
  0x18   : > { %s3858_s20 = scalar_select %p2934_p8, 1, 0 }
  0x19   : > { %s3859_s21 = scalar_select %p2938_p9, 1, 0 }
  0x1a   : > { %p247_p10 = scmp.eq.s32.totalorder %s2278_s14, 3  ;;  %s45_s23 = sor.u32 %s44_s18, %s43_s22 }
  0x1b   : > { %3860 = sst [smem:[#allocation16_spill]] %s3859_s21  ;;  %p46_p11 = scmp.eq.s32.totalorder %s45_s23, 0 }
  0x1c   : > { %p2944_p12 = por %p247_p10, %p61_p5  ;;  %p2571_p13 = scmp.lt.s32.totalorder %s2811_s12, 4 }
  0x1d   : > { %s2950_s25 = sand.u32 1, %s2791_s29   ;;  %s2364_s15 = sshll.u32 %s2803_s10, 4 }
  0x1e   : > { %s3861_s24 = scalar_select %p2944_p12, 1, 0 }
  0x1f   : > { %s2953_s26 = scalar_select %p46_p11, %s2791_s29, %s48_s17  }
  0x20   : > { %3862 = sst [smem:[#allocation17_spill]] %s3861_s24  ;;  %s2281_s13 = sshll.u32 %s2950_s25, 7 }
  0x21   : > { %3863 = sst [smem:[#allocation18_spill]] %s2953_s26  ;;  %s2284_s27 = sshll.u32 %s2807_s11, 5 }
  0x22   : > { %s289_s8 = scalar_lea.vmem [#allocation3], %s2281_s13  ;;  %s296_s21 = sadd.s32 %s2364_s15, %s2284_s27 }
  0x23   : > { %s299_s16 = sshll.u32 %s289_s8, 4  ;;  %s2285_s14 = sshll.u32 %s296_s21, 7  ;;  %s2958_s16 = int_to_ptr.vmem [resolvable:$true] %s299_s16 }
  0x24   : > { %p2962_p0 = pnand %p2571_p13, %p2926_p3  ;;  %s3865_s0 = sld [smem:[#allocation19_spill]] }
  0x25   : > { %s286_s8 = scalar_lea.sflag [#allocation4], %s2950_s25 }
  0x26   : > { %p2651_p2 = pneg %p2962_p0 }
  0x2a   : > { %s2969_s17 = scalar_lea.hbm %s3865_s0, %s2285_s14  ;;  %s2654_s21 = scalar_lea.hbm %s3865_s0, 8192 }
  0x2b   : > { %s2649_s27 = scalar_lea.hbm %s2969_s17, 2048  ;;  %p2655_p5 = scmp.lt.u32.totalorder %s2969_s17, %s3865_s0 }
  0x2c   : > { %p2650_p1 = scmp.ne.s32.totalorder %s2969_s17, %s2649_s27  ;;  %p2656_p6 = scmp.lt.u32.totalorder %s2654_s21, %s2649_s27 }
  0x2d   : > { %p2658_p10 = scmp.lt.u32.totalorder %s2649_s27, %s2969_s17 }
  0x2e   : > { %p2652_p3 = pnand %p2651_p2, %p2650_p1  ;;  %p2657_p7 = por %p2656_p6, %p2655_p5 }
  0x30   : > { %p2653_p4 = pneg %p2652_p3  ;;  %p2659_p11 = por %p2658_p10, %p2657_p7 }
  0x32   : > { %p2660_p13 = pnand %p2659_p11, %p2653_p4 }
  0x34   : > { %2663 = shalt.err (!%p2660_p13)
}
  0x35   : > { %s2664_s22 = scalar_lea.vmem %s2958_s16, 2048  ;;  %s2813_s23 = smov [#allocation3]  }
  0x36   : > { %p2665_p1 = scmp.ne.s32.totalorder %s2958_s16, %s2664_s22  ;;  %s2669_s15 = sshll.u32 %s2813_s23, 4  ;;  %s2670_s15 = int_to_ptr.vmem [resolvable:$false] %s2669_s15 }
  0x37   : > { %s2671_s19 = scalar_lea.vmem %s2670_s15, 4096  ;;  %p2672_p9 = scmp.lt.s32.totalorder %s2958_s16, %s2670_s15 }
  0x38   : > { %p2667_p3 = pnand %p2665_p1, %p2651_p2  ;;  %p2673_p5 = scmp.lt.s32.totalorder %s2671_s19, %s2664_s22 }
  0x3a   : > { %p2668_p12 = pneg %p2667_p3  ;;  %p2674_p6 = por %p2673_p5, %p2672_p9 }
  0x3c   : > { %p2675_p7 = pnand %p2674_p6, %p2668_p12 }
  0x3e   : > { %2678 = shalt.err (!%p2675_p7)
}
  0x3f   : > { %s2814_s27 = smov 128   ;;  %s2815_s21 = smov 8  }
  0x40   : > { %2563 = dma.hbm_to_vmem [thread:$0]  (!%p2962_p0), %s2969_s17, 2048, %s2958_s16, %s286_s8, %s2814_s27, %s2814_s27, %s2815_s21  }
  0x41   : > { %p2290_p9 = scmp.ge.s32.totalorder %s2811_s12, 1  ;;  %p330_p12 = scmp.lt.s32.totalorder %s2811_s12, 5 }
  0x42   : > { %s2286_s13 = sshll.u32 %s2950_s25, 5  ;;  %s2287_s22 = sshll.u32 %s2803_s10, 2 }
  0x43   : > { %p3005_p4 = pnand %p2290_p9, %p330_p12  ;;  %s2288_s23 = sshll.u32 %s2807_s11, 3 }
  0x44   : > { %s319_s15 = sadd.s32 %s2288_s23, %s2287_s22  ;;  %s313_s19 = scalar_lea.vmem [#allocation6], %s2286_s13 }
  0x45   : > { %s322_s0 = sshll.u32 %s313_s19, 4  ;;  %s2289_s26 = sshll.u32 %s319_s15, 7  ;;  %s3011_s0 = int_to_ptr.vmem [resolvable:$true] %s322_s0 }
  0x46   : > { %s3016_s16 = scalar_lea.hbm %s3833_s1, %s2289_s26  ;;  %s310_s17 = scalar_lea.sflag [#allocation7], %s2950_s25 }
  0x47   : > { %s2679_s8 = scalar_lea.hbm %s3016_s16, 512  ;;  %s2684_s23 = scalar_lea.hbm %s3833_s1, 2048 }
  0x48   : > { %p2680_p10 = scmp.ne.s32.totalorder %s3016_s16, %s2679_s8  ;;  %p2685_p1 = scmp.lt.u32.totalorder %s3016_s16, %s3833_s1 }
  0x49   : > { %p2686_p3 = scmp.lt.u32.totalorder %s2684_s23, %s2679_s8  ;;  %p2688_p6 = scmp.lt.u32.totalorder %s2679_s8, %s3016_s16 }
  0x4a   : > { %p2682_p11 = pnand %p2680_p10, %p2651_p2 }
  0x4b   : > { %p2687_p5 = por %p2686_p3, %p2685_p1 }
  0x4c   : > { %p2683_p13 = pneg %p2682_p11 }
  0x4d   : > { %p2689_p7 = por %p2688_p6, %p2687_p5 }
  0x4f   : > { %p2690_p9 = pnand %p2689_p7, %p2683_p13 }
  0x51   : > { %2693 = shalt.err (!%p2690_p9)
}
  0x52   : > { %s2694_s29 = scalar_lea.vmem %s3011_s0, 512  ;;  %s2816_s24 = smov [#allocation6]  }
  0x53   : > { %p2695_p12 = scmp.ne.s32.totalorder %s3011_s0, %s2694_s29  ;;  %s2699_s26 = sshll.u32 %s2816_s24, 4  ;;  %s2700_s26 = int_to_ptr.vmem [resolvable:$false] %s2699_s26 }
  0x54   : > { %s2701_s13 = scalar_lea.vmem %s2700_s26, 1024  ;;  %p2702_p8 = scmp.lt.s32.totalorder %s3011_s0, %s2700_s26 }
  0x55   : > { %p2697_p10 = pnand %p2695_p12, %p2651_p2  ;;  %p2703_p1 = scmp.lt.s32.totalorder %s2701_s13, %s2694_s29 }
  0x57   : > { %p2698_p11 = pneg %p2697_p10  ;;  %p2704_p3 = por %p2703_p1, %p2702_p8 }
  0x59   : > { %p2705_p5 = pnand %p2704_p3, %p2698_p11 }
  0x5b   : > { %2708 = shalt.err (!%p2705_p5)
}
  0x5c   : > { %2566 = dma.hbm_to_vmem [thread:$0]  (!%p2962_p0), %s3016_s16, 512, %s3011_s0, %s310_s17, %s2814_s27, %s2814_s27, %s2815_s21  }
  0x5d   : > { %334 = sbr.rel (%p3005_p4) target bundleno = 1611 (0x64b), region = 52  ;;  %s3050_s8 = sand.u32 (!%p3005_p4), 1, %s2787_s28  }
  0x5e   : > { %s2291_s22 = sshll.u32 (!%p3005_p4), %s3050_s8, 7  ;;  %s337_s18 = scalar_lea.sflag (!%p3005_p4), [#allocation4], %s3050_s8 }
  0x5f   : > { %s3056_s23 = scalar_lea.vmem (!%p3005_p4), [#allocation3], %s2291_s22  ;;  %p3867_p8 = scmp.ne.s32.totalorder (!%p3005_p4), %s3858_s20, 0 }
  0x64   : > { %2770 = dma.done.wait (%p3867_p8), %s337_s18, 2048  }
  0x65   : > { %2772 = vsyncadd (%p3867_p8), %s337_s18, 4294965248  ;;  %s2292_s0 = sshll.u32 %s3050_s8, 5  ;;  %s346_s25 = scalar_lea.sflag [#allocation7], %s3050_s8 }
  0x66   : > { %s3064_s27 = scalar_lea.vmem [#allocation6], %s2292_s0 }
  0x67   : > { %2774 = dma.done.wait (%p3867_p8), %s346_s25, 512  }
  0x68   : > { %2776 = vsyncadd (%p3867_p8), %s346_s25, 4294966784  ;;  %vm389_vm0 = vcmask 31744   ;;  %vm392_vm1 = vcmask 25600   ;;  %v2817_v0 = vmov 0.0   ;;  %vm446_vm2 = vcmask 130048   ;;  %v437_v1 = vld [vmem:[%s3834_s2] sm:$0xff] }
  0x69   : > { %390 = vst.msk [vmem:[#allocation2] sm:$0xff] %vm389_vm0, %v2817_v0  ;;  %391 = vst.msk [vmem:[#allocation2 + $0x8] sm:$0xff] %vm389_vm0, %v2817_v0  ;;  %v438_v2 = vld [vmem:[%s3834_s2 + $0x8] sm:$0xff]  ;;  %v3107_v3 = vld [vmem:[%s3056_s23] sm:$0xff]  ;;  %s3207_s19 = scalar_lea.vmem [#allocation8], %s2291_s22  ;;  %p2311_p0 = scmp.le.s32.totalorder %s2795_s30, 0 }
  0x6a   : > { %393 = vst.msk [vmem:[#allocation2 + $0x10] sm:$0x3] %vm392_vm1, %v2817_v0  ;;  %396 = vst.msk [vmem:[#allocation2 + $0x28] sm:$0x3] %vm392_vm1, %v2817_v0  ;;  %v2532_v4 = vpack.c.bf16 %v438_v2, %v437_v1  ;;  %2434 = vmatprep.mubr.msk.f32.mxu0 %vm446_vm2, %v3107_v3  ;;  %v3112_v5 = vld [vmem:[%s3056_s23 + $0x40] sm:$0xff]  ;;  %v3117_v6 = vld [vmem:[%s3056_s23 + $0x8] sm:$0xff] }
  0x6b   : > { %395 = vst.msk [vmem:[#allocation2 + $0x20] sm:$0xff] %vm389_vm0, %v2817_v0  ;;  %418 = vst.msk [vmem:[#allocation2 + $0xd8] sm:$0xff] %vm389_vm0, %v2817_v0  ;;  %2446 = vmatprep.mubr.msk.f32.mxu1 %vm446_vm2, %v3112_v5  ;;  %v3120_v7 = vld [vmem:[%s3056_s23 + $0x48] sm:$0xff]  ;;  %v3123_v8 = vld [vmem:[%s3056_s23 + $0x10] sm:$0xff] }
  0x6c   : > { %419 = vst.msk [vmem:[#allocation2 + $0xe0] sm:$0xff] %vm389_vm0, %v2817_v0  ;;  %394 = vst.msk [vmem:[#allocation2 + $0x18] sm:$0xff] %vm389_vm0, %v2817_v0  ;;  %2533 = vmatprep.subr.bf16.mxu0 %v2532_v4  ;;  %2552 = vmatprep.subr.bf16.mxu1 %v2532_v4  ;;  %v3126_v9 = vld [vmem:[%s3056_s23 + $0x50] sm:$0xff]  ;;  %v3137_v10 = vld [vmem:[%s3056_s23 + $0x18] sm:$0xff] }
  0x6d   : > { %420 = vst.msk [vmem:[#allocation2 + $0xe8] sm:$0x3] %vm392_vm1, %v2817_v0  ;;  %399 = vst.msk [vmem:[#allocation2 + $0x40] sm:$0x3] %vm392_vm1, %v2817_v0  ;;  %2535 = vmatpush3.bf16.msra.mxu0 %v2532_v4  ;;  %2553 = vmatpush3.bf16.msra.mxu1 %v2532_v4  ;;  %v3140_v11 = vld [vmem:[%s3056_s23 + $0x58] sm:$0xff]  ;;  %v3143_v12 = vld [vmem:[%s3056_s23 + $0x20] sm:$0xff] }
  0x6e   : > { %397 = vst.msk [vmem:[#allocation2 + $0x30] sm:$0xff] %vm389_vm0, %v2817_v0  ;;  %398 = vst.msk [vmem:[#allocation2 + $0x38] sm:$0xff] %vm389_vm0, %v2817_v0  ;;  %v3146_v13 = vld [vmem:[%s3056_s23 + $0x60] sm:$0xff]  ;;  %v3157_v14 = vld [vmem:[%s3056_s23 + $0x28] sm:$0xff] }
  0x6f   : > { %400 = vst.msk [vmem:[#allocation2 + $0x48] sm:$0xff] %vm389_vm0, %v2817_v0  ;;  %401 = vst.msk [vmem:[#allocation2 + $0x50] sm:$0xff] %vm389_vm0, %v2817_v0  ;;  %v3160_v15 = vld [vmem:[%s3056_s23 + $0x68] sm:$0xff]  ;;  %v3163_v16 = vld [vmem:[%s3056_s23 + $0x30] sm:$0xff] }
  0x70   : > { %402 = vst.msk [vmem:[#allocation2 + $0x58] sm:$0x3] %vm392_vm1, %v2817_v0  ;;  %405 = vst.msk [vmem:[#allocation2 + $0x70] sm:$0x3] %vm392_vm1, %v2817_v0  ;;  %2435 = vmatmul.mubr.msk.f32.vlgmr.msra.gmra.mrb[0].mxu0 %vm446_vm2, %v3117_v6  ;;  %2447 = vmatmul.mubr.msk.f32.vlgmr.msra.gmra.mrb[0].mxu1 %vm446_vm2, %v3120_v7  ;;  %v3166_v17 = vld [vmem:[%s3056_s23 + $0x70] sm:$0xff]  ;;  %v3177_v18 = vld [vmem:[%s3056_s23 + $0x38] sm:$0xff] }
  0x71   : > { %403 = vst.msk [vmem:[#allocation2 + $0x60] sm:$0xff] %vm389_vm0, %v2817_v0  ;;  %404 = vst.msk [vmem:[#allocation2 + $0x68] sm:$0xff] %vm389_vm0, %v2817_v0  ;;  %2437 = vmatprep.mubr.msk.f32.mxu0 %vm446_vm2, %v3123_v8  ;;  %2449 = vmatprep.mubr.msk.f32.mxu1 %vm446_vm2, %v3126_v9  ;;  %v3180_v19 = vld [vmem:[%s3056_s23 + $0x78] sm:$0xff]  ;;  %v2294_v20 = vld [vmem:[%s3835_s3] ss:$0 sm:$0xff] }
  0x72   : > { %406 = vst.msk [vmem:[#allocation2 + $0x78] sm:$0xff] %vm389_vm0, %v2817_v0  ;;  %407 = vst.msk [vmem:[#allocation2 + $0x80] sm:$0xff] %vm389_vm0, %v2817_v0 }
  0x73   : > { %408 = vst.msk [vmem:[#allocation2 + $0x88] sm:$0x3] %vm392_vm1, %v2817_v0  ;;  %411 = vst.msk [vmem:[#allocation2 + $0xa0] sm:$0x3] %vm392_vm1, %v2817_v0 }
  0x74   : > { %409 = vst.msk [vmem:[#allocation2 + $0x90] sm:$0xff] %vm389_vm0, %v2817_v0  ;;  %410 = vst.msk [vmem:[#allocation2 + $0x98] sm:$0xff] %vm389_vm0, %v2817_v0  ;;  %2438 = vmatmul.mubr.msk.f32.gmra.mrb[2].mxu0 %vm446_vm2, %v3137_v10  ;;  %2450 = vmatmul.mubr.msk.f32.gmra.mrb[2].mxu1 %vm446_vm2, %v3140_v11 }
  0x75   : > { %412 = vst.msk [vmem:[#allocation2 + $0xa8] sm:$0xff] %vm389_vm0, %v2817_v0  ;;  %413 = vst.msk [vmem:[#allocation2 + $0xb0] sm:$0xff] %vm389_vm0, %v2817_v0  ;;  %2440 = vmatprep.mubr.msk.f32.mxu0 %vm446_vm2, %v3143_v12  ;;  %2452 = vmatprep.mubr.msk.f32.mxu1 %vm446_vm2, %v3146_v13 }
  0x76   : > { %414 = vst.msk [vmem:[#allocation2 + $0xb8] sm:$0x3] %vm392_vm1, %v2817_v0  ;;  %417 = vst.msk [vmem:[#allocation2 + $0xd0] sm:$0x3] %vm392_vm1, %v2817_v0 }
  0x77   : > { %415 = vst.msk [vmem:[#allocation2 + $0xc0] sm:$0xff] %vm389_vm0, %v2817_v0  ;;  %416 = vst.msk [vmem:[#allocation2 + $0xc8] sm:$0xff] %vm389_vm0, %v2817_v0 }
  0x78   : > { %2441 = vmatmul.mubr.msk.f32.gmra.mrb[4].mxu0 %vm446_vm2, %v3157_v14  ;;  %2453 = vmatmul.mubr.msk.f32.gmra.mrb[4].mxu1 %vm446_vm2, %v3160_v15 }
  0x79   : > { %2443 = vmatprep.mubr.msk.f32.mxu0 %vm446_vm2, %v3163_v16  ;;  %2455 = vmatprep.mubr.msk.f32.mxu1 %vm446_vm2, %v3166_v17 }
  0x7c   : > { %2444 = vmatmul.mubr.msk.f32.gmra.mrb[6].mxu0 %vm446_vm2, %v3177_v18  ;;  %2456 = vmatmul.mubr.msk.f32.gmra.mrb[6].mxu1 %vm446_vm2, %v3180_v19 }
 0x143   : > { %v2436_v21 = vpop.f32.mrb[0].mxu0  ;;  %v2448_v22 = vpop.f32.mrb[0].mxu1 }
 0x144   : > { %v567_v23 = vadd.f32 %v2436_v21, %v2294_v20  ;;  %v607_v24 = vadd.f32 %v2448_v22, %v2294_v20  ;;  %v561_v25 = vpop.f32.mrb[1].mxu0  ;;  %v601_v26 = vpop.f32.mrb[1].mxu1  ;;  %v680_v22 = vld [vmem:[%s3834_s2 + $0x8] sm:$0xff] (!%p2311_p0) }
 0x145   : > { %v562_v27 = vadd.f32 %v2294_v20, %v561_v25  ;;  %v602_v28 = vadd.f32 %v2294_v20, %v601_v26  ;;  %v678_v25 = vld [vmem:[%s3064_s27 + $0x8] sm:$0xff] (!%p2311_p0)  ;;  %v2312_v26 = vld [vmem:[%s3835_s3] ss:$0 sm:$0xff] (!%p2311_p0) }
 0x146   : > { %v641_v29 = vmax.f32 %v567_v23, 0.0  ;;  %v649_v30 = vmax.f32 %v607_v24, 0.0  ;;  %v677_v23 = vld [vmem:[%s3064_s27] sm:$0xff] (!%p2311_p0) }
 0x147   : > { %v640_v31 = vmax.f32 %v562_v27, 0.0  ;;  %v648_v32 = vmax.f32 %v602_v28, 0.0  ;;  %v2439_v33 = vpop.f32.mrb[2].mxu0  ;;  %v2451_v34 = vpop.f32.mrb[2].mxu1  ;;  %2462 = vmatprep.mubr.msk.f32.mxu0 (!%p2311_p0), %vm446_vm2, %v677_v23 }
 0x148   : > { %658 = vst.msk [vmem:[#allocation2 + $0x21] sm:$0xff] %vm389_vm0, %v641_v29  ;;  %666 = vst.msk [vmem:[#allocation2 + $0x81] sm:$0xff] %vm389_vm0, %v649_v30  ;;  %v577_v35 = vadd.f32 %v2439_v33, %v2294_v20  ;;  %v617_v36 = vadd.f32 %v2451_v34, %v2294_v20  ;;  %v571_v37 = vpop.f32.mrb[3].mxu0  ;;  %v611_v38 = vpop.f32.mrb[3].mxu1 }
 0x149   : > { %657 = vst.msk [vmem:[#allocation2 + $0x19] sm:$0xff] %vm389_vm0, %v640_v31  ;;  %665 = vst.msk [vmem:[#allocation2 + $0x79] sm:$0xff] %vm389_vm0, %v648_v32  ;;  %v572_v39 = vadd.f32 %v2294_v20, %v571_v37  ;;  %v612_v40 = vadd.f32 %v2294_v20, %v611_v38 }
 0x14a   : > { %v643_v41 = vmax.f32 %v577_v35, 0.0  ;;  %v651_v42 = vmax.f32 %v617_v36, 0.0 }
 0x14b   : > { %v642_v43 = vmax.f32 %v572_v39, 0.0  ;;  %v650_v44 = vmax.f32 %v612_v40, 0.0  ;;  %v2442_v45 = vpop.f32.mrb[4].mxu0  ;;  %v2454_v46 = vpop.f32.mrb[4].mxu1 }
 0x14c   : > { %660 = vst.msk [vmem:[#allocation2 + $0x39] sm:$0xff] %vm389_vm0, %v643_v41  ;;  %668 = vst.msk [vmem:[#allocation2 + $0x99] sm:$0xff] %vm389_vm0, %v651_v42  ;;  %v587_v47 = vadd.f32 %v2442_v45, %v2294_v20  ;;  %v627_v48 = vadd.f32 %v2454_v46, %v2294_v20  ;;  %v581_v49 = vpop.f32.mrb[5].mxu0  ;;  %v621_v50 = vpop.f32.mrb[5].mxu1 }
 0x14d   : > { %659 = vst.msk [vmem:[#allocation2 + $0x31] sm:$0xff] %vm389_vm0, %v642_v43  ;;  %667 = vst.msk [vmem:[#allocation2 + $0x91] sm:$0xff] %vm389_vm0, %v650_v44  ;;  %v582_v51 = vadd.f32 %v2294_v20, %v581_v49  ;;  %v622_v52 = vadd.f32 %v2294_v20, %v621_v50 }
 0x14e   : > { %v645_v53 = vmax.f32 %v587_v47, 0.0  ;;  %v653_v54 = vmax.f32 %v627_v48, 0.0 }
 0x14f   : > { %v644_v55 = vmax.f32 %v582_v51, 0.0  ;;  %v652_v56 = vmax.f32 %v622_v52, 0.0  ;;  %v2445_v57 = vpop.f32.mrb[6].mxu0  ;;  %v2457_v58 = vpop.f32.mrb[6].mxu1  ;;  %676 = sbr.rel (%p2311_p0) target bundleno = 562 (0x232), region = 64 }
 0x150   : > { %662 = vst.msk [vmem:[#allocation2 + $0x51] sm:$0xff] %vm389_vm0, %v645_v53  ;;  %670 = vst.msk [vmem:[#allocation2 + $0xb1] sm:$0xff] %vm389_vm0, %v653_v54  ;;  %v597_v59 = vadd.f32 %v2445_v57, %v2294_v20  ;;  %v637_v60 = vadd.f32 %v2457_v58, %v2294_v20  ;;  %v591_v61 = vpop.f32.mrb[7].mxu0  ;;  %v631_v62 = vpop.f32.mrb[7].mxu1 }
 0x151   : > { %661 = vst.msk [vmem:[#allocation2 + $0x49] sm:$0xff] %vm389_vm0, %v644_v55  ;;  %669 = vst.msk [vmem:[#allocation2 + $0xa9] sm:$0xff] %vm389_vm0, %v652_v56  ;;  %v592_v63 = vadd.f32 %v2294_v20, %v591_v61  ;;  %v632_v0 = vadd.f32 %v2294_v20, %v631_v62  ;;  %v679_v20 = vld [vmem:[%s3834_s2] sm:$0xff] (!%p2311_p0) }
 0x152   : > { %v647_v1 = vmax.f32 %v597_v59, 0.0  ;;  %v655_v2 = vmax.f32 %v637_v60, 0.0  ;;  %v2536_v24 = vpack.c.bf16 (!%p2311_p0), %v680_v22, %v679_v20 }
 0x153   : > { %v646_v4 = vmax.f32 %v592_v63, 0.0  ;;  %v654_v21 = vmax.f32 %v632_v0, 0.0 }
 0x154   : > { %664 = vst.msk [vmem:[#allocation2 + $0x69] sm:$0xff] %vm389_vm0, %v647_v1  ;;  %672 = vst.msk [vmem:[#allocation2 + $0xc9] sm:$0xff] %vm389_vm0, %v655_v2  ;;  %2537 = vmatprep.subr.bf16.mxu0 (!%p2311_p0), %v2536_v24 }
 0x155   : > { %663 = vst.msk [vmem:[#allocation2 + $0x61] sm:$0xff] %vm389_vm0, %v646_v4  ;;  %671 = vst.msk [vmem:[#allocation2 + $0xc1] sm:$0xff] %vm389_vm0, %v654_v21  ;;  %2539 = vmatpush3.bf16.msra.mxu0 (!%p2311_p0), %v2536_v24 }
 0x158   : > { %2463 = vmatmul.mubr.msk.f32.vlgmr.msra.gmra.mrb[0].mxu0 %vm446_vm2, %v678_v25 }
 0x22b   : > { %v2464_v27 = vpop.f32.mrb[0].mxu0 }
 0x22c   : > { %v766_v28 = vadd.f32 %v2464_v27, %v2312_v26  ;;  %v760_v29 = vpop.f32.mrb[1].mxu0 }
 0x22d   : > { %v761_v30 = vadd.f32 %v2312_v26, %v760_v29 }
 0x22e   : > { %v770_v31 = vmax.f32 %v766_v28, 0.0 }
 0x22f   : > { %v769_v32 = vmax.f32 %v761_v30, 0.0 }
 0x230   : > { %772 = vst.msk [vmem:[#allocation2 + $0x9] sm:$0xff] %vm389_vm0, %v770_v31 }
 0x231   : > { %771 = vst.msk [vmem:[#allocation2 + $0x1] sm:$0xff] %vm389_vm0, %v769_v32 }
 0x232 PF: > { %p2315_p2 = scmp.ge.s32.totalorder %s2795_s30, 1 }
 0x233   : > { %v780_v33 = vld [vmem:[%s3834_s2] sm:$0xff] (!%p2315_p2)  ;;  %v781_v34 = vld [vmem:[%s3834_s2 + $0x8] sm:$0xff] (!%p2315_p2) }
 0x234   : > { %776 = sbr.rel (%p2315_p2) target bundleno = 788 (0x314), region = 68  ;;  %v2316_v35 = vld [vmem:[%s3064_s27 + $0x10] sm:$0xff] (!%p2315_p2)  ;;  %v2540_v36 = vpack.c.bf16 (!%p2315_p2), %v781_v34, %v780_v33  ;;  %v2317_v37 = vld [vmem:[%s3064_s27 + $0x18] sm:$0xff] (!%p2315_p2) }
 0x235   : > { %2469 = vmatprep.mubr.msk.f32.mxu0 (!%p2315_p2), %vm446_vm2, %v2316_v35  ;;  %v2318_v38 = vld [vmem:[%s3835_s3] ss:$0 sm:$0xff] (!%p2315_p2) }
 0x236   : > { %2541 = vmatprep.subr.bf16.mxu0 (!%p2315_p2), %v2540_v36 }
 0x237   : > { %2543 = vmatpush3.bf16.msra.mxu0 (!%p2315_p2), %v2540_v36 }
 0x23a   : > { %2470 = vmatmul.mubr.msk.f32.vlgmr.msra.gmra.mrb[0].mxu0 (!%p2315_p2), %vm446_vm2, %v2317_v37 }
 0x30d   : > { %v2471_v39 = vpop.f32.mrb[0].mxu0 }
 0x30e   : > { %v867_v40 = vadd.f32 %v2471_v39, %v2318_v38  ;;  %v861_v41 = vpop.f32.mrb[1].mxu0 }
 0x30f   : > { %v862_v42 = vadd.f32 %v2318_v38, %v861_v41 }
 0x310   : > { %v871_v43 = vmax.f32 %v867_v40, 0.0 }
 0x311   : > { %v870_v44 = vmax.f32 %v862_v42, 0.0 }
 0x312   : > { %874 = vst.msk [vmem:[#allocation2 + $0xe1] sm:$0xff] %vm389_vm0, %v871_v43 }
 0x313   : > { %873 = vst.msk [vmem:[#allocation2 + $0xd9] sm:$0xff] %vm389_vm0, %v870_v44 }
 0x314 PF: > { %v907_v45 = vld [vmem:[#allocation2 + $0x2] sm:$0xff]  ;;  %s2818_s27 = smov 8   ;;  %s2819_s16 = smov 4   ;;  %v908_v47 = vld [vmem:[#allocation2 + $0xa] sm:$0xff]  ;;  %v3247_v50 = vld [vmem:[#allocation2 + $0x18] sm:$0xff]  ;;  %vm1727_vm3 = vcmask 1043456  }
 0x315   : > { %v891_v46 = vld [vmem:[#allocation2 + $0x1] sm:$0xff]  ;;  %1100 = vrot.lane.b32.xlu1 %v907_v45, %s2818_s27  ;;  %v892_v48 = vld [vmem:[#allocation2 + $0x9] sm:$0xff]  ;;  %s2820_s17 = smov 12   ;;  %v893_v51 = vld [vmem:[#allocation2 + $0x19] sm:$0xff]  ;;  %s2821_s15 = smov 16   ;;  %vm1548_vm4 = vcmask 64512  }
 0x316   : > { %1036 = vrot.lane.b32.xlu0 %v891_v46, %s2819_s16  ;;  %v3245_v49 = vld [vmem:[#allocation2 + $0x20] sm:$0xff]  ;;  %s2822_s29 = smov 20   ;;  %v3259_v54 = vld [vmem:[#allocation2 + $0x30] sm:$0xff]  ;;  %v1667_v57 = vld [vmem:[%s3836_s4 + $0x8] sm:$0xff]  ;;  %s2823_s18 = smov 24   ;;  %vm1565_vm5 = vcmask 97280  }
 0x317   : > { %v955_v52 = vld [vmem:[#allocation2 + $0x1a] sm:$0xff]  ;;  %v956_v55 = vld [vmem:[#allocation2 + $0x22] sm:$0xff]  ;;  %v1668_v59 = vld [vmem:[%s3836_s4 + $0x10] sm:$0xff]  ;;  %s2824_s21 = smov 28   ;;  %s2825_s26 = smov 32   ;;  %vm1598_vm6 = vcmask 162816  }
 0x318   : > { %v940_v53 = vld [vmem:[#allocation2 + $0x21] sm:$0xff]  ;;  %v1669_v60 = vld [vmem:[%s3836_s4 + $0x18] sm:$0xff]  ;;  %v990_v20 = vld [vmem:[#allocation2 + $0x49] sm:$0xff]  ;;  %vm1615_vm7 = vcmask 195584   ;;  %vm1632_vm8 = vcmask 228352   ;;  %vm1649_vm9 = vcmask 261120  }
 0x319   : > { %1102 = vrot.lane.b32.xlu1 %v908_v47, %s2818_s27  ;;  %v1666_v56 = vld [vmem:[%s3836_s4] sm:$0xff]  ;;  %v988_v61 = vld [vmem:[#allocation2 + $0x31] sm:$0xff]  ;;  %v2548_v63 = vpack.c.bf16 %v1669_v60, %v1668_v59  ;;  %v3300_v21 = vld [vmem:[#allocation2 + $0x48] sm:$0xff]  ;;  %vm1678_vm10 = vcmask 293888   ;;  %s2360_s23 = sshll.u32 %s2799_s9, 5  ;;  %s3868_s25 = sld [smem:[#allocation16_spill]] }
 0x31a   : > { %1038 = vrot.lane.b32.xlu0 %v892_v48, %s2819_s16  ;;  %v2544_v58 = vpack.c.bf16 %v1667_v57, %v1666_v56  ;;  %v3279_v62 = vld [vmem:[#allocation2 + $0x38] sm:$0xff]  ;;  %v1670_v0 = vld [vmem:[%s3836_s4 + $0x20] sm:$0xf]  ;;  %v3308_v22 = vld [vmem:[#allocation2 + $0x50] sm:$0xff]  ;;  %s3869_s24 = sld [smem:[#allocation20_spill]] }
 0x31b   : > { %v1004_v1 = vld [vmem:[#allocation2 + $0x32] sm:$0xff]  ;;  %v1005_v4 = vld [vmem:[#allocation2 + $0x3a] sm:$0xff]  ;;  %v1006_v23 = vld [vmem:[#allocation2 + $0x4a] sm:$0xff] }
 0x31c   : > { %2545 = vmatprep.subr.bf16.mxu0 %v2544_v58  ;;  %v989_v2 = vld [vmem:[#allocation2 + $0x39] sm:$0xff]  ;;  %v991_v24 = vld [vmem:[#allocation2 + $0x51] sm:$0xff]  ;;  %v992_v27 = vld [vmem:[#allocation2 + $0x61] sm:$0xff] }
 0x31d   : > { %1166 = vrot.lane.b32.xlu1 %v3245_v49, %s2820_s17  ;;  %2547 = vmatpush3.bf16.msra.mxu0 %v2544_v58  ;;  %v1007_v25 = vld [vmem:[#allocation2 + $0x52] sm:$0xff]  ;;  %v3324_v26 = vld [vmem:[#allocation2 + $0x60] sm:$0xff]  ;;  %v3332_v28 = vld [vmem:[#allocation2 + $0x68] sm:$0xff] }
 0x31e   : > { %1164 = vrot.lane.b32.xlu0 %v3247_v50, %s2820_s17  ;;  %2549 = vmatprep.subr.bf16.mxu0 %v2548_v63  ;;  %v1008_v29 = vld [vmem:[#allocation2 + $0x62] sm:$0xff]  ;;  %v1009_v31 = vld [vmem:[#allocation2 + $0x6a] sm:$0xff]  ;;  %v3348_v34 = vld [vmem:[#allocation2 + $0x78] sm:$0xff] }
 0x31f   : > { %v993_v30 = vld [vmem:[#allocation2 + $0x69] sm:$0xff]  ;;  %v994_v39 = vld [vmem:[#allocation2 + $0x79] sm:$0xff]  ;;  %v995_v46 = vld [vmem:[#allocation2 + $0x81] sm:$0xff]  ;;  %p3870_p13 = scmp.ne.s32.totalorder %s3868_s25, 0 }
 0x320   : > { %v3360_v40 = vld [vmem:[#allocation2 + $0x80] sm:$0xff] }
 0x321   : > { %1040 = vrot.lane.b32.xlu1 %v893_v51, %s2819_s16  ;;  %2551 = vmatpush3.bf16.msra.mxu0 %v2548_v63  ;;  %v1010_v45 = vld [vmem:[#allocation2 + $0x7a] sm:$0xff]  ;;  %v3388_v63 = vld [vmem:[#allocation2 + $0x90] sm:$0xff] }
 0x322   : > { %1228 = vrot.lane.b32.xlu0 %v893_v51, %s2821_s15  ;;  %2480 = vmatprep.subr.msk.mxu0 %vm1727_vm3, %v1670_v0  ;;  %v875_v57 = vld [vmem:[#allocation2] sm:$0xff] }
 0x325   : > { %1292 = vrot.lane.b32.xlu1 %v955_v52, %s2822_s29  ;;  %2481 = vmatpush3.msk.msra.mxu0 %vm1727_vm3, %v1670_v0 }
 0x326   : > { %1230 = vrot.lane.b32.xlu0 %v940_v53, %s2821_s15 }
 0x329   : > { %1104 = vrot.lane.b32.xlu1 %v955_v52, %s2818_s27 }
 0x32a   : > { %1042 = vrot.lane.b32.xlu0 %v940_v53, %s2819_s16  ;;  %v1011_v53 = vld [vmem:[#allocation2 + $0x82] sm:$0xff] }
 0x32d   : > { %1356 = vrot.lane.b32.xlu1 %v3259_v54, %s2823_s18 }
 0x32e   : > { %1294 = vrot.lane.b32.xlu0 %v956_v55, %s2822_s29 }
 0x331   : > { %1168 = vrot.lane.b32.xlu1 %v3259_v54, %s2820_s17 }
 0x332   : > { %1106 = vrot.lane.b32.xlu0 %v956_v55, %s2818_s27 }
 0x335   : > { %1420 = vrot.lane.b32.xlu1 %v988_v61, %s2824_s21 }
 0x336   : > { %1358 = vrot.lane.b32.xlu0 %v3279_v62, %s2823_s18 }
 0x339   : > { %1232 = vrot.lane.b32.xlu1 %v988_v61, %s2821_s15 }
 0x33a   : > { %1170 = vrot.lane.b32.xlu0 %v3279_v62, %s2820_s17 }
 0x33d   : > { %1484 = vrot.lane.b32.xlu1 %v1004_v1, %s2825_s26 }
 0x33e   : > { %1422 = vrot.lane.b32.xlu0 %v989_v2, %s2824_s21 }
 0x341   : > { %1234 = vrot.lane.b32.xlu1 %v989_v2, %s2821_s15 }
 0x342   : > { %1044 = vrot.lane.b32.xlu0 %v988_v61, %s2819_s16 }
 0x345   : > { %1486 = vrot.lane.b32.xlu1 %v1005_v4, %s2825_s26 }
 0x346   : > { %1296 = vrot.lane.b32.xlu0 %v1004_v1, %s2822_s29 }
 0x349   : > { %1108 = vrot.lane.b32.xlu1 %v1004_v1, %s2818_s27 }
 0x34a   : > { %1046 = vrot.lane.b32.xlu0 %v989_v2, %s2819_s16 }
 0x34d   : > { %1360 = vrot.lane.b32.xlu1 %v3300_v21, %s2823_s18 }
 0x34e   : > { %1298 = vrot.lane.b32.xlu0 %v1005_v4, %s2822_s29 }
 0x351   : > { %1172 = vrot.lane.b32.xlu1 %v3300_v21, %s2820_s17 }
 0x352   : > { %1110 = vrot.lane.b32.xlu0 %v1005_v4, %s2818_s27  ;;  %v876_v4 = vld [vmem:[#allocation2 + $0x8] sm:$0xff] }
 0x355   : > { %1424 = vrot.lane.b32.xlu1 %v990_v20, %s2824_s21 }
 0x356   : > { %1362 = vrot.lane.b32.xlu0 %v3308_v22, %s2823_s18 }
 0x359   : > { %1236 = vrot.lane.b32.xlu1 %v990_v20, %s2821_s15 }
 0x35a   : > { %1174 = vrot.lane.b32.xlu0 %v3308_v22, %s2820_s17 }
 0x35d   : > { %1488 = vrot.lane.b32.xlu1 %v1006_v23, %s2825_s26 }
 0x35e   : > { %1426 = vrot.lane.b32.xlu0 %v991_v24, %s2824_s21 }
 0x361   : > { %1238 = vrot.lane.b32.xlu1 %v991_v24, %s2821_s15 }
 0x362   : > { %1048 = vrot.lane.b32.xlu0 %v990_v20, %s2819_s16 }
 0x365   : > { %1490 = vrot.lane.b32.xlu1 %v1007_v25, %s2825_s26 }
 0x366   : > { %1300 = vrot.lane.b32.xlu0 %v1006_v23, %s2822_s29 }
 0x369   : > { %1112 = vrot.lane.b32.xlu1 %v1006_v23, %s2818_s27 }
 0x36a   : > { %1050 = vrot.lane.b32.xlu0 %v991_v24, %s2819_s16 }
 0x36d   : > { %1364 = vrot.lane.b32.xlu1 %v3324_v26, %s2823_s18 }
 0x36e   : > { %1302 = vrot.lane.b32.xlu0 %v1007_v25, %s2822_s29 }
 0x371   : > { %1176 = vrot.lane.b32.xlu1 %v3324_v26, %s2820_s17 }
 0x372   : > { %1114 = vrot.lane.b32.xlu0 %v1007_v25, %s2818_s27 }
 0x375   : > { %1428 = vrot.lane.b32.xlu1 %v992_v27, %s2824_s21 }
 0x376   : > { %1366 = vrot.lane.b32.xlu0 %v3332_v28, %s2823_s18 }
 0x379   : > { %1240 = vrot.lane.b32.xlu1 %v992_v27, %s2821_s15 }
 0x37a   : > { %1178 = vrot.lane.b32.xlu0 %v3332_v28, %s2820_s17 }
 0x37d   : > { %1492 = vrot.lane.b32.xlu1 %v1008_v29, %s2825_s26 }
 0x37e   : > { %1430 = vrot.lane.b32.xlu0 %v993_v30, %s2824_s21 }
 0x381   : > { %1242 = vrot.lane.b32.xlu1 %v993_v30, %s2821_s15 }
 0x382   : > { %1052 = vrot.lane.b32.xlu0 %v992_v27, %s2819_s16 }
 0x385   : > { %1494 = vrot.lane.b32.xlu1 %v1009_v31, %s2825_s26 }
 0x386   : > { %1304 = vrot.lane.b32.xlu0 %v1008_v29, %s2822_s29 }
 0x387   : > { %v1101_v32 = vpop.permute.xlu1 %1100 }
 0x388   : > { %v1037_v33 = vpop.permute.xlu0 %1036 }
 0x389   : > { %1116 = vrot.lane.b32.xlu1 %v1008_v29, %s2818_s27  ;;  %v1532_v58 = vsel %vm389_vm0, %v875_v57, %v1037_v33  ;;  %v996_v33 = vld [vmem:[#allocation2 + $0x91] sm:$0xff] }
 0x38a   : > { %1054 = vrot.lane.b32.xlu0 %v993_v30, %s2819_s16  ;;  %v1549_v61 = vsel %vm1548_vm4, %v1532_v58, %v1101_v32 }
 0x38b   : > { %v3350_v35 = vpop.permute.xlu1 %1102 }
 0x38c   : > { %v1039_v36 = vpop.permute.xlu0 %1038 }
 0x38d   : > { %1368 = vrot.lane.b32.xlu1 %v3348_v34, %s2823_s18  ;;  %v1533_v25 = vsel %vm389_vm0, %v876_v4, %v1039_v36 }
 0x38e   : > { %1306 = vrot.lane.b32.xlu0 %v1009_v31, %s2822_s29  ;;  %v1550_v32 = vsel %vm1548_vm4, %v1533_v25, %v3350_v35 }
 0x38f   : > { %v3355_v37 = vpop.permute.xlu1 %1166 }
 0x390   : > { %v1165_v38 = vpop.permute.xlu0 %1164  ;;  %v1567_v36 = vsel %vm1565_vm5, %v1550_v32, %v3355_v37 }
 0x391   : > { %1180 = vrot.lane.b32.xlu1 %v3348_v34, %s2820_s17  ;;  %v1566_v0 = vsel %vm1565_vm5, %v1549_v61, %v1165_v38  ;;  %v3410_v38 = vld [vmem:[#allocation2 + $0x98] sm:$0xff] }
 0x392   : > { %1118 = vrot.lane.b32.xlu0 %v1009_v31, %s2818_s27  ;;  %v1013_v61 = vld [vmem:[#allocation2 + $0x9a] sm:$0xff] }
 0x393   : > { %v3362_v41 = vpop.permute.xlu1 %1040 }
 0x394   : > { %v1229_v42 = vpop.permute.xlu0 %1228 }
 0x395   : > { %1432 = vrot.lane.b32.xlu1 %v994_v39, %s2824_s21  ;;  %v1582_v20 = vsel %vm446_vm2, %v1566_v0, %v1229_v42 }
 0x396   : > { %1370 = vrot.lane.b32.xlu0 %v3360_v40, %s2823_s18 }
 0x397   : > { %v1293_v43 = vpop.permute.xlu1 %1292 }
 0x398   : > { %v1231_v44 = vpop.permute.xlu0 %1230  ;;  %v1599_v23 = vsel %vm1598_vm6, %v1582_v20, %v1293_v43 }
 0x399   : > { %1244 = vrot.lane.b32.xlu1 %v994_v39, %s2821_s15  ;;  %v1583_v43 = vsel %vm446_vm2, %v1567_v36, %v1231_v44  ;;  %v1012_v44 = vld [vmem:[#allocation2 + $0x92] sm:$0xff] }
 0x39a   : > { %1182 = vrot.lane.b32.xlu0 %v3360_v40, %s2820_s17 }
 0x39b   : > { %v3370_v47 = vpop.permute.xlu1 %1104 }
 0x39c   : > { %v3372_v48 = vpop.permute.xlu0 %1042 }
 0x39d   : > { %1496 = vrot.lane.b32.xlu1 %v1010_v45, %s2825_s26 }
 0x39e   : > { %1434 = vrot.lane.b32.xlu0 %v995_v46, %s2824_s21 }
 0x39f   : > { %v1357_v51 = vpop.permute.xlu1 %1356 }
 0x3a0   : > { %v1295_v52 = vpop.permute.xlu0 %1294  ;;  %v1616_v24 = vsel %vm1615_vm7, %v1599_v23, %v1357_v51 }
 0x3a1   : > { %1246 = vrot.lane.b32.xlu1 %v995_v46, %s2821_s15 }
 0x3a2   : > { %1056 = vrot.lane.b32.xlu0 %v994_v39, %s2819_s16 }
 0x3a3   : > { %v3378_v55 = vpop.permute.xlu1 %1168 }
 0x3a4   : > { %v3380_v56 = vpop.permute.xlu0 %1106 }
 0x3a5   : > { %1498 = vrot.lane.b32.xlu1 %v1011_v53, %s2825_s26 }
 0x3a6   : > { %1308 = vrot.lane.b32.xlu0 %v1010_v45, %s2822_s29 }
 0x3a7   : > { %v1421_v59 = vpop.permute.xlu1 %1420 }
 0x3a8   : > { %v1359_v60 = vpop.permute.xlu0 %1358  ;;  %v1633_v27 = vsel %vm1632_vm8, %v1616_v24, %v1421_v59  ;;  %v1534_v24 = vsel %vm389_vm0, %v3247_v50, %v3362_v41 }
 0x3a9   : > { %1120 = vrot.lane.b32.xlu1 %v1010_v45, %s2818_s27  ;;  %v1600_v45 = vsel %vm1598_vm6, %v1583_v43, %v1295_v52  ;;  %v997_v52 = vld [vmem:[#allocation2 + $0x99] sm:$0xff]  ;;  %v1551_v25 = vsel %vm1548_vm4, %v1534_v24, %v3370_v47  ;;  %v1535_v43 = vsel %vm389_vm0, %v3245_v49, %v3372_v48 }
 0x3aa   : > { %1058 = vrot.lane.b32.xlu0 %v995_v46, %s2819_s16  ;;  %v1617_v35 = vsel %vm1615_vm7, %v1600_v45, %v1359_v60  ;;  %v998_v45 = vld [vmem:[#allocation2 + $0xa9] sm:$0xff]  ;;  %v1015_v24 = vld [vmem:[#allocation2 + $0xb2] sm:$0xff] }
 0x3ab   : > { %v3391_v1 = vpop.permute.xlu1 %1232 }
 0x3ac   : > { %v3393_v2 = vpop.permute.xlu0 %1170 }
 0x3ad   : > { %1372 = vrot.lane.b32.xlu1 %v3388_v63, %s2823_s18 }
 0x3ae   : > { %1310 = vrot.lane.b32.xlu0 %v1011_v53, %s2822_s29 }
 0x3af   : > { %v1485_v29 = vpop.permute.xlu1 %1484 }
 0x3b0   : > { %v1423_v30 = vpop.permute.xlu0 %1422  ;;  %v1650_v31 = vsel %vm1649_vm9, %v1633_v27, %v1485_v29  ;;  %v3449_v27 = vld [vmem:[#allocation2 + $0xa8] sm:$0xff]  ;;  %v1568_v29 = vsel %vm1565_vm5, %v1551_v25, %v3378_v55 }
 0x3b1   : > { %1184 = vrot.lane.b32.xlu1 %v3388_v63, %s2820_s17  ;;  %2482 = vmatprep.mubr.msk.f32.mxu0 %vm1678_vm10, %v1650_v31  ;;  %v1634_v46 = vsel %vm1632_vm8, %v1617_v35, %v1423_v30  ;;  %v1584_v32 = vsel %vm446_vm2, %v1568_v29, %v3391_v1  ;;  %v1552_v1 = vsel %vm1548_vm4, %v1535_v43, %v3380_v56  ;;  %v3473_v35 = vld [vmem:[#allocation2 + $0xb0] sm:$0xff] }
 0x3b2   : > { %1122 = vrot.lane.b32.xlu0 %v1011_v53, %s2818_s27 }
 0x3b3   : > { %v1235_v39 = vpop.permute.xlu1 %1234 }
 0x3b4   : > { %v3414_v42 = vpop.permute.xlu0 %1044 }
 0x3b5   : > { %1436 = vrot.lane.b32.xlu1 %v996_v33, %s2824_s21 }
 0x3b6   : > { %1374 = vrot.lane.b32.xlu0 %v3410_v38, %s2823_s18 }
 0x3b7   : > { %v1487_v51 = vpop.permute.xlu1 %1486 }
 0x3b8   : > { %v1297_v53 = vpop.permute.xlu0 %1296  ;;  %v1651_v37 = vsel %vm1649_vm9, %v1634_v46, %v1487_v51  ;;  %v1569_v46 = vsel %vm1565_vm5, %v1552_v1, %v3393_v2 }
 0x3b9   : > { %1248 = vrot.lane.b32.xlu1 %v996_v33, %s2821_s15  ;;  %2483 = vmatmul.mubr.msk.f32.vlgmr.msra.gmra.mrb[0].mxu0 %vm1678_vm10, %v1651_v37  ;;  %v1601_v50 = vsel %vm1598_vm6, %v1584_v32, %v1297_v53  ;;  %v1585_v49 = vsel %vm446_vm2, %v1569_v46, %v1235_v39  ;;  %v1014_v39 = vld [vmem:[#allocation2 + $0xaa] sm:$0xff] }
 0x3ba   : > { %1186 = vrot.lane.b32.xlu0 %v3410_v38, %s2820_s17 }
 0x3bb   : > { %v3428_v57 = vpop.permute.xlu1 %1108 }
 0x3bc   : > { %v3430_v58 = vpop.permute.xlu0 %1046 }
 0x3bd   : > { %1500 = vrot.lane.b32.xlu1 %v1012_v44, %s2825_s26 }
 0x3be   : > { %1438 = vrot.lane.b32.xlu0 %v997_v52, %s2824_s21 }
 0x3bf   : > { %v1361_v59 = vpop.permute.xlu1 %1360 }
 0x3c0   : > { %v1299_v60 = vpop.permute.xlu0 %1298  ;;  %v1618_v41 = vsel %vm1615_vm7, %v1601_v50, %v1361_v59  ;;  %v999_v59 = vld [vmem:[#allocation2 + $0xb1] sm:$0xff] }
 0x3c1   : > { %1250 = vrot.lane.b32.xlu1 %v997_v52, %s2821_s15  ;;  %v1602_v48 = vsel %vm1598_vm6, %v1585_v49, %v1299_v60 }
 0x3c2   : > { %1060 = vrot.lane.b32.xlu0 %v996_v33, %s2819_s16 }
 0x3c3   : > { %v3436_v0 = vpop.permute.xlu1 %1172 }
 0x3c4   : > { %v3438_v4 = vpop.permute.xlu0 %1110 }
 0x3c5   : > { %1502 = vrot.lane.b32.xlu1 %v1013_v61, %s2825_s26 }
 0x3c6   : > { %1312 = vrot.lane.b32.xlu0 %v1012_v44, %s2822_s29 }
 0x3c7   : > { %v1425_v20 = vpop.permute.xlu1 %1424 }
 0x3c8   : > { %v1363_v23 = vpop.permute.xlu0 %1362  ;;  %v1635_v47 = vsel %vm1632_vm8, %v1618_v41, %v1425_v20  ;;  %v1536_v41 = vsel %vm389_vm0, %v3259_v54, %v3414_v42 }
 0x3c9   : > { %1124 = vrot.lane.b32.xlu1 %v1012_v44, %s2818_s27  ;;  %v1619_v56 = vsel %vm1615_vm7, %v1602_v48, %v1363_v23  ;;  %v1000_v48 = vld [vmem:[#allocation2 + $0xc1] sm:$0xff] }
 0x3ca   : > { %1062 = vrot.lane.b32.xlu0 %v997_v52, %s2819_s16 }
 0x3cb   : > { %v1237_v30 = vpop.permute.xlu1 %1236 }
 0x3cc   : > { %v3453_v31 = vpop.permute.xlu0 %1174 }
 0x3cd   : > { %1376 = vrot.lane.b32.xlu1 %v3449_v27, %s2823_s18 }
 0x3ce   : > { %1314 = vrot.lane.b32.xlu0 %v1013_v61, %s2822_s29 }
 0x3cf   : > { %v1489_v33 = vpop.permute.xlu1 %1488 }
 0x3d0   : > { %v1427_v36 = vpop.permute.xlu0 %1426  ;;  %v1652_v55 = vsel %vm1649_vm9, %v1635_v47, %v1489_v33  ;;  %v1553_v47 = vsel %vm1548_vm4, %v1536_v41, %v3428_v57  ;;  %v984_v33 = vld [vmem:[#allocation2 + $0xc0] sm:$0xff]  ;;  %v970_v41 = vld [vmem:[#allocation2 + $0xca] sm:$0xff] }
 0x3d1   : > { %1188 = vrot.lane.b32.xlu1 %v3449_v27, %s2820_s17  ;;  %2485 = vmatprep.mubr.msk.f32.mxu0 %vm1678_vm10, %v1652_v55  ;;  %v1636_v37 = vsel %vm1632_vm8, %v1619_v56, %v1427_v36  ;;  %v1570_v36 = vsel %vm1565_vm5, %v1553_v47, %v3436_v0  ;;  %v1537_v0 = vsel %vm389_vm0, %v3279_v62, %v3430_v58  ;;  %v985_v56 = vld [vmem:[#allocation2 + $0xc8] sm:$0xff] }
 0x3d2   : > { %1126 = vrot.lane.b32.xlu0 %v1013_v61, %s2818_s27  ;;  %v1586_v1 = vsel %vm446_vm2, %v1570_v36, %v1237_v30  ;;  %v1554_v30 = vsel %vm1548_vm4, %v1537_v0, %v3438_v4  ;;  %v987_v36 = vld [vmem:[#allocation2 + $0xe0] sm:$0xff] }
 0x3d3   : > { %v1239_v51 = vpop.permute.xlu1 %1238 }
 0x3d4   : > { %v3477_v53 = vpop.permute.xlu0 %1048 }
 0x3d5   : > { %1440 = vrot.lane.b32.xlu1 %v998_v45, %s2824_s21 }
 0x3d6   : > { %1378 = vrot.lane.b32.xlu0 %v3473_v35, %s2823_s18 }
 0x3d7   : > { %v1491_v44 = vpop.permute.xlu1 %1490 }
 0x3d8   : > { %v1301_v52 = vpop.permute.xlu0 %1300  ;;  %v1653_v2 = vsel %vm1649_vm9, %v1636_v37, %v1491_v44  ;;  %v1571_v37 = vsel %vm1565_vm5, %v1554_v30, %v3453_v31 }
 0x3d9   : > { %1252 = vrot.lane.b32.xlu1 %v998_v45, %s2821_s15  ;;  %2486 = vmatmul.mubr.msk.f32.gmra.mrb[2].mxu0 %vm1678_vm10, %v1653_v2  ;;  %v1587_v62 = vsel %vm446_vm2, %v1571_v37, %v1239_v51  ;;  %v1016_v51 = vld [vmem:[#allocation2 + $0xc2] sm:$0xff] }
 0x3da   : > { %1190 = vrot.lane.b32.xlu0 %v3473_v35, %s2820_s17 }
 0x3db   : > { %v3491_v60 = vpop.permute.xlu1 %1112 }
 0x3dc   : > { %v3493_v61 = vpop.permute.xlu0 %1050 }
 0x3dd   : > { %1504 = vrot.lane.b32.xlu1 %v1014_v39, %s2825_s26 }
 0x3de   : > { %1442 = vrot.lane.b32.xlu0 %v999_v59, %s2824_s21 }
 0x3df   : > { %v1365_v20 = vpop.permute.xlu1 %1364 }
 0x3e0   : > { %v1303_v23 = vpop.permute.xlu0 %1302 }
 0x3e1   : > { %1254 = vrot.lane.b32.xlu1 %v999_v59, %s2821_s15  ;;  %v1604_v58 = vsel %vm1598_vm6, %v1587_v62, %v1303_v23  ;;  %v1018_v62 = vld [vmem:[#allocation2 + $0xda] sm:$0xff] }
 0x3e2   : > { %1064 = vrot.lane.b32.xlu0 %v998_v45, %s2819_s16  ;;  %v1603_v45 = vsel %vm1598_vm6, %v1586_v1, %v1301_v52  ;;  %v986_v1 = vld [vmem:[#allocation2 + $0xd8] sm:$0xff] }
 0x3e3   : > { %v3499_v25 = vpop.permute.xlu1 %1176  ;;  %v1620_v54 = vsel %vm1615_vm7, %v1603_v45, %v1365_v20  ;;  %v1001_v20 = vld [vmem:[#allocation2 + $0xc9] sm:$0xff] }
 0x3e4   : > { %v3501_v29 = vpop.permute.xlu0 %1114 }
 0x3e5   : > { %1506 = vrot.lane.b32.xlu1 %v1015_v24, %s2825_s26 }
 0x3e6   : > { %1316 = vrot.lane.b32.xlu0 %v1014_v39, %s2822_s29 }
 0x3e7   : > { %v1429_v32 = vpop.permute.xlu1 %1428 }
 0x3e8   : > { %v1367_v50 = vpop.permute.xlu0 %1366  ;;  %v1637_v42 = vsel %vm1632_vm8, %v1620_v54, %v1429_v32 }
 0x3e9   : > { %1128 = vrot.lane.b32.xlu1 %v1014_v39, %s2818_s27  ;;  %v1621_v4 = vsel %vm1615_vm7, %v1604_v58, %v1367_v50 }
 0x3ea   : > { %1066 = vrot.lane.b32.xlu0 %v999_v59, %s2819_s16 }
 0x3eb   : > { %v1241_v55 = vpop.permute.xlu1 %1240 }
 0x3ec   : > { %v3514_v43 = vpop.permute.xlu0 %1178 }
 0x3ed   : > { %1380 = vrot.lane.b32.xlu1 %v984_v33, %s2823_s18 }
 0x3ee   : > { %1318 = vrot.lane.b32.xlu0 %v1015_v24, %s2822_s29 }
 0x3ef   : > { %v1493_v57 = vpop.permute.xlu1 %1492 }
 0x3f0   : > { %v1431_v46 = vpop.permute.xlu0 %1430  ;;  %v1654_v49 = vsel %vm1649_vm9, %v1637_v42, %v1493_v57  ;;  %v1538_v42 = vsel %vm389_vm0, %v3300_v21, %v3477_v53  ;;  %v1019_v53 = vld [vmem:[#allocation2 + $0xe2] sm:$0xff] }
 0x3f1   : > { %1192 = vrot.lane.b32.xlu1 %v984_v33, %s2820_s17  ;;  %2488 = vmatprep.mubr.msk.f32.mxu0 %vm1678_vm10, %v1654_v49  ;;  %v1638_v2 = vsel %vm1632_vm8, %v1621_v4, %v1431_v46  ;;  %v1555_v57 = vsel %vm1548_vm4, %v1538_v42, %v3491_v60  ;;  %v1003_v46 = vld [vmem:[#allocation2 + $0xe1] sm:$0xff]  ;;  %v1002_v49 = vld [vmem:[#allocation2 + $0xd9] sm:$0xff] }
 0x3f2   : > { %1130 = vrot.lane.b32.xlu0 %v1015_v24, %s2818_s27  ;;  %v1572_v0 = vsel %vm1565_vm5, %v1555_v57, %v3499_v25 }
 0x3f3   : > { %v3533_v44 = vpop.permute.xlu1 %1242 }
 0x3f4   : > { %v3535_v52 = vpop.permute.xlu0 %1052 }
 0x3f5   : > { %1444 = vrot.lane.b32.xlu1 %v1000_v48, %s2824_s21 }
 0x3f6   : > { %1382 = vrot.lane.b32.xlu0 %v985_v56, %s2823_s18 }
 0x3f7   : > { %v1495_v39 = vpop.permute.xlu1 %1494 }
 0x3f8   : > { %v1305_v59 = vpop.permute.xlu0 %1304  ;;  %v1655_v31 = vsel %vm1649_vm9, %v1638_v2, %v1495_v39  ;;  %v1539_v2 = vsel %vm389_vm0, %v3308_v22, %v3493_v61 }
 0x3f9   : > { %1256 = vrot.lane.b32.xlu1 %v1000_v48, %s2821_s15  ;;  %2489 = vmatmul.mubr.msk.f32.gmra.mrb[4].mxu0 %vm1678_vm10, %v1655_v31  ;;  %v1556_v39 = vsel %vm1548_vm4, %v1539_v2, %v3501_v29 }
 0x3fa   : > { %1194 = vrot.lane.b32.xlu0 %v985_v56, %s2820_s17  ;;  %v1588_v56 = vsel %vm446_vm2, %v1572_v0, %v1241_v55  ;;  %v1892_v55 = vld [vmem:[%s3838_s6] sm:$0xf]  ;;  %s2826_s17 = smov [#allocation8]  }
 0x3fb   : > { %v3547_v23 = vpop.permute.xlu1 %1116  ;;  %v1605_v37 = vsel %vm1598_vm6, %v1588_v56, %v1305_v59  ;;  %2506 = vmatprep.subr.msk.mxu1 %vm1727_vm3, %v1892_v55  ;;  %v1573_v59 = vsel %vm1565_vm5, %v1556_v39, %v3514_v43 }
 0x3fc   : > { %v3549_v24 = vpop.permute.xlu0 %1054  ;;  %2507 = vmatpush3.msk.msra.mxu1 %vm1727_vm3, %v1892_v55  ;;  %v1589_v22 = vsel %vm446_vm2, %v1573_v59, %v3533_v44 }
 0x3fd   : > { %1508 = vrot.lane.b32.xlu1 %v1016_v51, %s2825_s26 }
 0x3fe   : > { %1446 = vrot.lane.b32.xlu0 %v1001_v20, %s2824_s21 }
 0x3ff   : > { %v1369_v32 = vpop.permute.xlu1 %1368 }
 0x400   : > { %v1307_v50 = vpop.permute.xlu0 %1306  ;;  %v1622_v21 = vsel %vm1615_vm7, %v1605_v37, %v1369_v32 }
 0x401   : > { %1320 = vrot.lane.b32.xlu1 %v1016_v51, %s2822_s29  ;;  %v1606_v61 = vsel %vm1598_vm6, %v1589_v22, %v1307_v50  ;;  %v1540_v50 = vsel %vm389_vm0, %v3324_v26, %v3535_v52  ;;  %v1541_v26 = vsel %vm389_vm0, %v3332_v28, %v3549_v24 }
 0x402   : > { %1258 = vrot.lane.b32.xlu0 %v1001_v20, %s2821_s15  ;;  %s2713_s15 = sshll.u32 %s2826_s17, 4  ;;  %s2714_s15 = int_to_ptr.vmem [resolvable:$false] %s2713_s15 }
 0x403   : > { %v1181_v47 = vpop.permute.xlu1 %1180 }
 0x404   : > { %v3555_v33 = vpop.permute.xlu0 %1118 }
 0x405   : > { %1322 = vrot.lane.b32.xlu1 %v970_v41, %s2822_s29  ;;  %v1558_v52 = vsel %vm1548_vm4, %v1541_v26, %v3555_v33  ;;  %s2715_s29 = scalar_lea.vmem %s2714_s15, 4096 }
 0x406   : > { %1510 = vrot.lane.b32.xlu0 %v970_v41, %s2825_s26 }
 0x407   : > { %v1433_v45 = vpop.permute.xlu1 %1432 }
 0x408   : > { %v1371_v54 = vpop.permute.xlu0 %1370  ;;  %v1639_v60 = vsel %vm1632_vm8, %v1622_v21, %v1433_v45 }
 0x409   : > { %1386 = vrot.lane.b32.xlu1 %v987_v36, %s2823_s18  ;;  %v1623_v20 = vsel %vm1615_vm7, %v1606_v61, %v1371_v54  ;;  %v1557_v54 = vsel %vm1548_vm4, %v1540_v50, %v3547_v23 }
 0x40a   : > { %1384 = vrot.lane.b32.xlu0 %v986_v1, %s2823_s18  ;;  %v1574_v0 = vsel %vm1565_vm5, %v1557_v54, %v1181_v47  ;;  %s2365_s18 = sshll.u32 %s2795_s30, 4 }
 0x40b   : > { %v1245_v30 = vpop.permute.xlu1 %1244  ;;  %s2158_s0 = sadd.s32 %s2365_s18, %s2360_s23 }
 0x40c   : > { %v1183_v48 = vpop.permute.xlu0 %1182  ;;  %v1590_v21 = vsel %vm446_vm2, %v1574_v0, %v1245_v30  ;;  %s2361_s20 = sshll.u32 %s2158_s0, 7 }
 0x40d   : > { %1450 = vrot.lane.b32.xlu1 %v1003_v46, %s2824_s21  ;;  %v1575_v23 = vsel %vm1565_vm5, %v1558_v52, %v1183_v48  ;;  %s3771_s9 = scalar_lea.hbm %s3869_s24, %s2361_s20 }
 0x40e   : > { %1448 = vrot.lane.b32.xlu0 %v1002_v49, %s2824_s21  ;;  %s2161_s21 = sshll.u32 %s3207_s19, 4  ;;  %s3773_s21 = int_to_ptr.vmem [resolvable:$true] %s2161_s21 }
 0x40f   : > { %v1497_v58 = vpop.permute.xlu1 %1496  ;;  %s2709_s16 = scalar_lea.vmem %s3773_s21, 2048  ;;  %p2716_p9 = scmp.lt.s32.totalorder %s3773_s21, %s2714_s15 }
 0x410   : > { %v1435_v4 = vpop.permute.xlu0 %1434  ;;  %v1656_v25 = vsel %vm1649_vm9, %v1639_v60, %v1497_v58  ;;  %p2710_p4 = scmp.ne.s32.totalorder %s3773_s21, %s2709_s16  ;;  %p2717_p12 = scmp.lt.s32.totalorder %s2715_s29, %s2709_s16 }
 0x411   : > { %1514 = vrot.lane.b32.xlu1 %v1019_v53, %s2825_s26  ;;  %2491 = vmatprep.mubr.msk.f32.mxu0 %vm1678_vm10, %v1656_v25  ;;  %v1640_v29 = vsel %vm1632_vm8, %v1623_v20, %v1435_v4 }
 0x412   : > { %1512 = vrot.lane.b32.xlu0 %v1018_v62, %s2825_s26  ;;  %s2145_s26 = scalar_lea.sflag [#allocation5], %s3050_s8  ;;  %p2711_p6 = pnand %p2710_p4, %p3870_p13 }
 0x413   : > { %v1247_v31 = vpop.permute.xlu1 %1246  ;;  %p2718_p10 = por %p2717_p12, %p2716_p9 }
 0x414   : > { %v1057_v51 = vpop.permute.xlu0 %1056  ;;  %v1591_v55 = vsel %vm446_vm2, %v1575_v23, %v1247_v31  ;;  %p2712_p7 = pneg %p2711_p6 }
 0x416   : > { %p2719_p11 = pnand %p2718_p10, %p2712_p7 }
 0x417   : > { %v1499_v32 = vpop.permute.xlu1 %1498 }
 0x418   : > { %v1309_v41 = vpop.permute.xlu0 %1308  ;;  %v1657_v36 = vsel %vm1649_vm9, %v1640_v29, %v1499_v32 }
 0x419   : > { %2492 = vmatmul.mubr.msk.f32.gmra.mrb[6].mxu0 %vm1678_vm10, %v1657_v36  ;;  %v1607_v53 = vsel %vm1598_vm6, %v1590_v21, %v1309_v41  ;;  %v1542_v36 = vsel %vm389_vm0, %v3348_v34, %v1057_v51 }
 0x41b   : > { %v1121_v43 = vpop.permute.xlu1 %1120 }
 0x41c   : > { %v1059_v1 = vpop.permute.xlu0 %1058 }
 0x41d   : > { %v1543_v34 = vsel %vm389_vm0, %v3360_v40, %v1059_v1 }
 0x41f   : > { %v1373_v45 = vpop.permute.xlu1 %1372 }
 0x420   : > { %v1311_v42 = vpop.permute.xlu0 %1310  ;;  %v1624_v62 = vsel %vm1615_vm7, %v1607_v53, %v1373_v45  ;;  %v1559_v45 = vsel %vm1548_vm4, %v1542_v36, %v1121_v43 }
 0x421   : > { %v1608_v2 = vsel %vm1598_vm6, %v1591_v55, %v1311_v42 }
 0x423   : > { %v1185_v57 = vpop.permute.xlu1 %1184 }
 0x424   : > { %v1123_v46 = vpop.permute.xlu0 %1122  ;;  %v1576_v42 = vsel %vm1565_vm5, %v1559_v45, %v1185_v57 }
 0x425   : > { %v1560_v51 = vsel %vm1548_vm4, %v1543_v34, %v1123_v46 }
 0x427   : > { %v1437_v49 = vpop.permute.xlu1 %1436 }
 0x428   : > { %v1375_v44 = vpop.permute.xlu0 %1374  ;;  %v1641_v60 = vsel %vm1632_vm8, %v1624_v62, %v1437_v49 }
 0x429   : > { %v1625_v39 = vsel %vm1615_vm7, %v1608_v2, %v1375_v44 }
 0x42b   : > { %v1249_v56 = vpop.permute.xlu1 %1248 }
 0x42c   : > { %v1187_v37 = vpop.permute.xlu0 %1186  ;;  %v1592_v50 = vsel %vm446_vm2, %v1576_v42, %v1249_v56 }
 0x42d   : > { %v1577_v43 = vsel %vm1565_vm5, %v1560_v51, %v1187_v37 }
 0x42f   : > { %v1501_v58 = vpop.permute.xlu1 %1500 }
 0x430   : > { %v1439_v4 = vpop.permute.xlu0 %1438  ;;  %v1658_v25 = vsel %vm1649_vm9, %v1641_v60, %v1501_v58 }
 0x431   : > { %2494 = vmatprep.mubr.msk.f32.mxu0 %vm1678_vm10, %v1658_v25  ;;  %v1642_v59 = vsel %vm1632_vm8, %v1625_v39, %v1439_v4 }
 0x433   : > { %v1251_v47 = vpop.permute.xlu1 %1250 }
 0x434   : > { %v1061_v30 = vpop.permute.xlu0 %1060  ;;  %v1593_v58 = vsel %vm446_vm2, %v1577_v43, %v1251_v47 }
 0x437   : > { %v1503_v22 = vpop.permute.xlu1 %1502 }
 0x438   : > { %v1313_v61 = vpop.permute.xlu0 %1312  ;;  %v1659_v28 = vsel %vm1649_vm9, %v1642_v59, %v1503_v22  ;;  %v1544_v22 = vsel %vm389_vm0, %v3388_v63, %v1061_v30 }
 0x439   : > { %2495 = vmatmul.mubr.msk.f32.gmra.mrb[8].mxu0 %vm1678_vm10, %v1659_v28  ;;  %v1609_v54 = vsel %vm1598_vm6, %v1592_v50, %v1313_v61 }
 0x43b   : > { %v1125_v24 = vpop.permute.xlu1 %1124 }
 0x43c   : > { %v1063_v33 = vpop.permute.xlu0 %1062  ;;  %v1561_v61 = vsel %vm1548_vm4, %v1544_v22, %v1125_v24 }
 0x43d   : > { %v1545_v63 = vsel %vm389_vm0, %v3410_v38, %v1063_v33 }
 0x43f   : > { %v1377_v20 = vpop.permute.xlu1 %1376 }
 0x440   : > { %v1315_v48 = vpop.permute.xlu0 %1314  ;;  %v1626_v0 = vsel %vm1615_vm7, %v1609_v54, %v1377_v20 }
 0x441   : > { %v1610_v4 = vsel %vm1598_vm6, %v1593_v58, %v1315_v48 }
 0x443   : > { %v1189_v29 = vpop.permute.xlu1 %1188 }
 0x444   : > { %v1127_v32 = vpop.permute.xlu0 %1126  ;;  %v1578_v28 = vsel %vm1565_vm5, %v1561_v61, %v1189_v29 }
 0x445   : > { %v1562_v30 = vsel %vm1548_vm4, %v1545_v63, %v1127_v32 }
 0x447   : > { %v1441_v41 = vpop.permute.xlu1 %1440 }
 0x448   : > { %v1379_v31 = vpop.permute.xlu0 %1378  ;;  %v1643_v21 = vsel %vm1632_vm8, %v1626_v0, %v1441_v41 }
 0x449   : > { %v1627_v25 = vsel %vm1615_vm7, %v1610_v4, %v1379_v31 }
 0x44b   : > { %v1253_v49 = vpop.permute.xlu1 %1252 }
 0x44c   : > { %v1191_v44 = vpop.permute.xlu0 %1190  ;;  %v1594_v41 = vsel %vm446_vm2, %v1578_v28, %v1253_v49 }
 0x44d   : > { %v1579_v24 = vsel %vm1565_vm5, %v1562_v30, %v1191_v44 }
 0x44f   : > { %v1505_v53 = vpop.permute.xlu1 %1504 }
 0x450   : > { %v1443_v62 = vpop.permute.xlu0 %1442  ;;  %v1660_v60 = vsel %vm1649_vm9, %v1643_v21, %v1505_v53 }
 0x451   : > { %2497 = vmatprep.mubr.msk.f32.mxu0 %vm1678_vm10, %v1660_v60  ;;  %v1644_v26 = vsel %vm1632_vm8, %v1627_v25, %v1443_v62 }
 0x453   : > { %v1255_v57 = vpop.permute.xlu1 %1254 }
 0x454   : > { %v1065_v56 = vpop.permute.xlu0 %1064  ;;  %v1595_v0 = vsel %vm446_vm2, %v1579_v24, %v1255_v57 }
 0x455   : > { %v1546_v44 = vsel %vm389_vm0, %v3449_v27, %v1065_v56 }
 0x457   : > { %v1507_v52 = vpop.permute.xlu1 %1506 }
 0x458   : > { %v1317_v23 = vpop.permute.xlu0 %1316  ;;  %v1661_v40 = vsel %vm1649_vm9, %v1644_v26, %v1507_v52 }
 0x459   : > { %2498 = vmatmul.mubr.msk.f32.gmra.mrb[10].mxu0 %vm1678_vm10, %v1661_v40  ;;  %v1611_v31 = vsel %vm1598_vm6, %v1594_v41, %v1317_v23 }
 0x45b   : > { %v1129_v1 = vpop.permute.xlu1 %1128 }
 0x45c   : > { %v1067_v46 = vpop.permute.xlu0 %1066  ;;  %v1563_v43 = vsel %vm1548_vm4, %v1546_v44, %v1129_v1 }
 0x45d   : > { %v1547_v51 = vsel %vm389_vm0, %v3473_v35, %v1067_v46 }
 0x45f   : > { %v1381_v55 = vpop.permute.xlu1 %1380 }
 0x460   : > { %v1319_v37 = vpop.permute.xlu0 %1318  ;;  %v1628_v36 = vsel %vm1615_vm7, %v1611_v31, %v1381_v55 }
 0x461   : > { %v1612_v21 = vsel %vm1598_vm6, %v1595_v0, %v1319_v37 }
 0x463   : > { %v1193_v2 = vpop.permute.xlu1 %1192 }
 0x464   : > { %v1131_v39 = vpop.permute.xlu0 %1130  ;;  %v1580_v58 = vsel %vm1565_vm5, %v1563_v43, %v1193_v2 }
 0x465   : > { %v1564_v57 = vsel %vm1548_vm4, %v1547_v51, %v1131_v39 }
 0x467   : > { %v1445_v59 = vpop.permute.xlu1 %1444 }
 0x468   : > { %v1383_v47 = vpop.permute.xlu0 %1382  ;;  %v1645_v45 = vsel %vm1632_vm8, %v1628_v36, %v1445_v59  ;;  %v2321_v59 = vld [vmem:[%s3837_s5] ss:$0 sm:$0xff] }
 0x469   : > { %v1629_v53 = vsel %vm1615_vm7, %v1612_v21, %v1383_v47 }
 0x46b   : > { %v1257_v20 = vpop.permute.xlu1 %1256 }
 0x46c   : > { %v1195_v48 = vpop.permute.xlu0 %1194  ;;  %v1596_v52 = vsel %vm446_vm2, %v1580_v58, %v1257_v20 }
 0x46d   : > { %v1581_v4 = vsel %vm1565_vm5, %v1564_v57, %v1195_v48 }
 0x46f   : > { %v1509_v42 = vpop.permute.xlu1 %1508 }
 0x470   : > { %v1447_v50 = vpop.permute.xlu0 %1446  ;;  %v1662_v54 = vsel %vm1649_vm9, %v1645_v45, %v1509_v42 }
 0x471   : > { %2500 = vmatprep.mubr.msk.f32.mxu0 %vm1678_vm10, %v1662_v54  ;;  %v1646_v62 = vsel %vm1632_vm8, %v1629_v53, %v1447_v50 }
 0x473   : > { %v1321_v29 = vpop.permute.xlu1 %1320 }
 0x474   : > { %v1259_v49 = vpop.permute.xlu0 %1258  ;;  %v1613_v40 = vsel %vm1598_vm6, %v1596_v52, %v1321_v29 }
 0x475   : > { %v1597_v23 = vsel %vm446_vm2, %v1581_v4, %v1259_v49 }
 0x477   : > { %v1323_v60 = vpop.permute.xlu1 %1322 }
 0x478   : > { %v1511_v34 = vpop.permute.xlu0 %1510  ;;  %v1614_v27 = vsel %vm1598_vm6, %v1597_v23, %v1323_v60 }
 0x479   : > { %v1663_v38 = vsel %vm1649_vm9, %v1646_v62, %v1511_v34 }
 0x47a   : > { %2501 = vmatmul.mubr.msk.f32.gmra.mrb[12].mxu0 %vm1678_vm10, %v1663_v38 }
 0x47b   : > { %v1387_v33 = vpop.permute.xlu1 %1386 }
 0x47c   : > { %v1385_v32 = vpop.permute.xlu0 %1384  ;;  %v1631_v35 = vsel %vm1615_vm7, %v1614_v27, %v1387_v33 }
 0x47d   : > { %v1630_v56 = vsel %vm1615_vm7, %v1613_v40, %v1385_v32 }
 0x47f   : > { %v1451_v25 = vpop.permute.xlu1 %1450 }
 0x480   : > { %v1449_v26 = vpop.permute.xlu0 %1448  ;;  %v1648_v1 = vsel %vm1632_vm8, %v1631_v35, %v1451_v25 }
 0x481   : > { %v1647_v46 = vsel %vm1632_vm8, %v1630_v56, %v1449_v26 }
 0x483   : > { %v1515_v55 = vpop.permute.xlu1 %1514 }
 0x484   : > { %v1513_v37 = vpop.permute.xlu0 %1512  ;;  %v1665_v2 = vsel %vm1649_vm9, %v1648_v1, %v1515_v55 }
 0x485   : > { %v1664_v39 = vsel %vm1649_vm9, %v1647_v46, %v1513_v37 }
 0x486   : > { %2503 = vmatprep.mubr.msk.f32.mxu0 %vm1678_vm10, %v1664_v39 }
 0x487   : > { %2504 = vmatmul.mubr.msk.f32.gmra.mrb[14].mxu0 %vm1678_vm10, %v1665_v2 }
 0x48c   : > { %v2484_v47 = vpop.f32.mrb[0].mxu0 }
 0x48d   : > { %v1803_v22 = vadd.f32 %v2484_v47, %v2321_v59  ;;  %v1797_v61 = vpop.f32.mrb[1].mxu0 }
 0x48e   : > { %v1798_v28 = vadd.f32 %v2321_v59, %v1797_v61 }
 0x48f   : > { %v1877_v48 = vmax.f32 %v1803_v22, 0.0  ;;  %v3703_v22 = vld [vmem:[%s3839_s7] ss:$0 sm:$0xff] }
 0x490   : > { %v1876_v20 = vmax.f32 %v1798_v28, 0.0 }
 0x492   : > { %2508 = vmatprep.mubr.msk.f32.mxu1 %vm389_vm0, %v1876_v20 }
 0x493   : > { %2509 = vmatmul.mubr.msk.f32.vlgmr.msra.gmra.mrb[0].mxu1 %vm389_vm0, %v1877_v48 }
 0x4ac   : > { %v2487_v41 = vpop.f32.mrb[2].mxu0 }
 0x4ad   : > { %v1813_v31 = vadd.f32 %v2487_v41, %v2321_v59  ;;  %v1807_v36 = vpop.f32.mrb[3].mxu0 }
 0x4ae   : > { %v1808_v45 = vadd.f32 %v2321_v59, %v1807_v36 }
 0x4af   : > { %v1879_v50 = vmax.f32 %v1813_v31, 0.0 }
 0x4b0   : > { %v1878_v42 = vmax.f32 %v1808_v45, 0.0 }
 0x4b2   : > { %2511 = vmatprep.mubr.msk.f32.mxu1 %vm389_vm0, %v1878_v42 }
 0x4b3   : > { %2512 = vmatmul.mubr.msk.f32.gmra.mrb[2].mxu1 %vm389_vm0, %v1879_v50 }
 0x4cc   : > { %v2490_v54 = vpop.f32.mrb[4].mxu0 }
 0x4cd   : > { %v1823_v63 = vadd.f32 %v2490_v54, %v2321_v59  ;;  %v1817_v30 = vpop.f32.mrb[5].mxu0 }
 0x4ce   : > { %v1818_v24 = vadd.f32 %v2321_v59, %v1817_v30 }
 0x4cf   : > { %v1881_v49 = vmax.f32 %v1823_v63, 0.0 }
 0x4d0   : > { %v1880_v29 = vmax.f32 %v1818_v24, 0.0 }
 0x4d2   : > { %2514 = vmatprep.mubr.msk.f32.mxu1 %vm389_vm0, %v1880_v29 }
 0x4d3   : > { %2515 = vmatmul.mubr.msk.f32.gmra.mrb[4].mxu1 %vm389_vm0, %v1881_v49 }
 0x4ec   : > { %v2493_v0 = vpop.f32.mrb[6].mxu0 }
 0x4ed   : > { %v1833_v21 = vadd.f32 %v2493_v0, %v2321_v59  ;;  %v1827_v53 = vpop.f32.mrb[7].mxu0 }
 0x4ee   : > { %v1828_v62 = vadd.f32 %v2321_v59, %v1827_v53 }
 0x4ef   : > { %v1883_v34 = vmax.f32 %v1833_v21, 0.0 }
 0x4f0   : > { %v1882_v60 = vmax.f32 %v1828_v62, 0.0 }
 0x4f2   : > { %2517 = vmatprep.mubr.msk.f32.mxu1 %vm389_vm0, %v1882_v60 }
 0x4f3   : > { %2518 = vmatmul.mubr.msk.f32.gmra.mrb[6].mxu1 %vm389_vm0, %v1883_v34 }
 0x50c   : > { %v2496_v38 = vpop.f32.mrb[8].mxu0 }
 0x50d   : > { %v1843_v33 = vadd.f32 %v2496_v38, %v2321_v59  ;;  %v1837_v32 = vpop.f32.mrb[9].mxu0 }
 0x50e   : > { %v1838_v44 = vadd.f32 %v2321_v59, %v1837_v32 }
 0x50f   : > { %v1885_v43 = vmax.f32 %v1843_v33, 0.0 }
 0x510   : > { %v1884_v51 = vmax.f32 %v1838_v44, 0.0 }
 0x512   : > { %2520 = vmatprep.mubr.msk.f32.mxu1 %vm389_vm0, %v1884_v51 }
 0x513   : > { %2521 = vmatmul.mubr.msk.f32.gmra.mrb[8].mxu1 %vm389_vm0, %v1885_v43 }
 0x52c   : > { %v2499_v57 = vpop.f32.mrb[10].mxu0 }
 0x52d   : > { %v1853_v58 = vadd.f32 %v2499_v57, %v2321_v59  ;;  %v1847_v4 = vpop.f32.mrb[11].mxu0 }
 0x52e   : > { %v1848_v25 = vadd.f32 %v2321_v59, %v1847_v4 }
 0x52f   : > { %v1887_v52 = vmax.f32 %v1853_v58, 0.0 }
 0x530   : > { %v1886_v26 = vmax.f32 %v1848_v25, 0.0 }
 0x532   : > { %2523 = vmatprep.mubr.msk.f32.mxu1 %vm389_vm0, %v1886_v26 }
 0x533   : > { %2524 = vmatmul.mubr.msk.f32.gmra.mrb[10].mxu1 %vm389_vm0, %v1887_v52 }
 0x54d   : > { %v2502_v23 = vpop.f32.mrb[12].mxu0 }
 0x54e   : > { %v1863_v40 = vadd.f32 %v2502_v23, %v2321_v59  ;;  %v1857_v27 = vpop.f32.mrb[13].mxu0 }
 0x54f   : > { %v1858_v35 = vadd.f32 %v2321_v59, %v1857_v27 }
 0x550   : > { %v1889_v1 = vmax.f32 %v1863_v40, 0.0 }
 0x551   : > { %v1888_v56 = vmax.f32 %v1858_v35, 0.0 }
 0x553   : > { %2526 = vmatprep.mubr.msk.f32.mxu1 %vm389_vm0, %v1888_v56 }
 0x554   : > { %2527 = vmatmul.mubr.msk.f32.gmra.mrb[12].mxu1 %vm389_vm0, %v1889_v1 }
 0x55a   : > { %v2505_v46 = vpop.f32.mrb[14].mxu0 }
 0x55b   : > { %v1873_v55 = vadd.f32 %v2505_v46, %v2321_v59  ;;  %v1867_v37 = vpop.f32.mrb[15].mxu0 }
 0x55c   : > { %v1868_v2 = vadd.f32 %v2321_v59, %v1867_v37 }
 0x55d   : > { %v1891_v47 = vmax.f32 %v1873_v55, 0.0 }
 0x55e   : > { %v1890_v39 = vmax.f32 %v1868_v2, 0.0 }
 0x560   : > { %2529 = vmatprep.mubr.msk.f32.mxu1 %vm389_vm0, %v1890_v39 }
 0x561   : > { %2530 = vmatmul.mubr.msk.f32.gmra.mrb[14].mxu1 %vm389_vm0, %v1891_v47 }
 0x566   : > { %v2510_v61 = vpop.f32.mrb[0].mxu1 }
 0x567   : > { %v2023_v28 = vadd.f32 %v2510_v61, %v3703_v22  ;;  %v2017_v20 = vpop.f32.mrb[1].mxu1 }
 0x568   : > { %v2018_v48 = vadd.f32 %v3703_v22, %v2017_v20 }
 0x569   : > { %v2097_v59 = vadd.f32 %v2023_v28, %v3117_v6 }
 0x56a   : > { %v2096_v41 = vadd.f32 %v2018_v48, %v3107_v3 }
 0x56b   : > { %v2113_v31 = vmax.f32 %v2097_v59, 0.0 }
 0x56c   : > { %v2112_v36 = vmax.f32 %v2096_v41, 0.0 }
 0x56d   : > { %2129 = vst.msk [vmem:[%s3207_s19 + $0x8] sm:$0xff] %vm446_vm2, %v2113_v31 }
 0x56e   : > { %2128 = vst.msk [vmem:[%s3207_s19] sm:$0xff] %vm446_vm2, %v2112_v36 }
 0x586   : > { %v2513_v45 = vpop.f32.mrb[2].mxu1 }
 0x587   : > { %v2033_v42 = vadd.f32 %v2513_v45, %v3703_v22  ;;  %v2027_v50 = vpop.f32.mrb[3].mxu1 }
 0x588   : > { %v2028_v54 = vadd.f32 %v3703_v22, %v2027_v50 }
 0x589   : > { %v2099_v63 = vadd.f32 %v2033_v42, %v3137_v10 }
 0x58a   : > { %v2098_v6 = vadd.f32 %v2028_v54, %v3123_v8 }
 0x58b   : > { %v2115_v30 = vmax.f32 %v2099_v63, 0.0 }
 0x58c   : > { %v2114_v3 = vmax.f32 %v2098_v6, 0.0 }
 0x58d   : > { %2131 = vst.msk [vmem:[%s3207_s19 + $0x18] sm:$0xff] %vm446_vm2, %v2115_v30 }
 0x58e   : > { %2130 = vst.msk [vmem:[%s3207_s19 + $0x10] sm:$0xff] %vm446_vm2, %v2114_v3 }
 0x5a6   : > { %v2516_v24 = vpop.f32.mrb[4].mxu1 }
 0x5a7   : > { %v2043_v29 = vadd.f32 %v2516_v24, %v3703_v22  ;;  %v2037_v49 = vpop.f32.mrb[5].mxu1 }
 0x5a8   : > { %v2038_v0 = vadd.f32 %v3703_v22, %v2037_v49 }
 0x5a9   : > { %v2101_v21 = vadd.f32 %v2043_v29, %v3157_v14 }
 0x5aa   : > { %v2100_v10 = vadd.f32 %v2038_v0, %v3143_v12 }
 0x5ab   : > { %v2117_v53 = vmax.f32 %v2101_v21, 0.0 }
 0x5ac   : > { %v2116_v8 = vmax.f32 %v2100_v10, 0.0 }
 0x5ad   : > { %2133 = vst.msk [vmem:[%s3207_s19 + $0x28] sm:$0xff] %vm446_vm2, %v2117_v53 }
 0x5ae   : > { %2132 = vst.msk [vmem:[%s3207_s19 + $0x20] sm:$0xff] %vm446_vm2, %v2116_v8 }
 0x5c6   : > { %v2519_v62 = vpop.f32.mrb[6].mxu1 }
 0x5c7   : > { %v2053_v60 = vadd.f32 %v2519_v62, %v3703_v22  ;;  %v2047_v34 = vpop.f32.mrb[7].mxu1 }
 0x5c8   : > { %v2048_v38 = vadd.f32 %v3703_v22, %v2047_v34 }
 0x5c9   : > { %v2103_v33 = vadd.f32 %v2053_v60, %v3177_v18 }
 0x5ca   : > { %v2102_v14 = vadd.f32 %v2048_v38, %v3163_v16 }
 0x5cb   : > { %v2119_v32 = vmax.f32 %v2103_v33, 0.0 }
 0x5cc   : > { %v2118_v12 = vmax.f32 %v2102_v14, 0.0 }
 0x5cd   : > { %2135 = vst.msk [vmem:[%s3207_s19 + $0x38] sm:$0xff] %vm446_vm2, %v2119_v32 }
 0x5ce   : > { %2134 = vst.msk [vmem:[%s3207_s19 + $0x30] sm:$0xff] %vm446_vm2, %v2118_v12 }
 0x5e6   : > { %v2522_v44 = vpop.f32.mrb[8].mxu1 }
 0x5e7   : > { %v2063_v51 = vadd.f32 %v2522_v44, %v3703_v22  ;;  %v2057_v43 = vpop.f32.mrb[9].mxu1 }
 0x5e8   : > { %v2058_v57 = vadd.f32 %v3703_v22, %v2057_v43 }
 0x5e9   : > { %v2105_v58 = vadd.f32 %v2063_v51, %v3120_v7 }
 0x5ea   : > { %v2104_v18 = vadd.f32 %v2058_v57, %v3112_v5 }
 0x5eb   : > { %v2121_v4 = vmax.f32 %v2105_v58, 0.0 }
 0x5ec   : > { %v2120_v16 = vmax.f32 %v2104_v18, 0.0 }
 0x5ed   : > { %2137 = vst.msk [vmem:[%s3207_s19 + $0x48] sm:$0xff] %vm446_vm2, %v2121_v4 }
 0x5ee   : > { %2136 = vst.msk [vmem:[%s3207_s19 + $0x40] sm:$0xff] %vm446_vm2, %v2120_v16 }
 0x606   : > { %v2525_v25 = vpop.f32.mrb[10].mxu1 }
 0x607   : > { %v2073_v26 = vadd.f32 %v2525_v25, %v3703_v22  ;;  %v2067_v52 = vpop.f32.mrb[11].mxu1 }
 0x608   : > { %v2068_v23 = vadd.f32 %v3703_v22, %v2067_v52 }
 0x609   : > { %v2107_v40 = vadd.f32 %v2073_v26, %v3140_v11 }
 0x60a   : > { %v2106_v7 = vadd.f32 %v2068_v23, %v3126_v9 }
 0x60b   : > { %v2123_v5 = vmax.f32 %v2107_v40, 0.0 }
 0x60c   : > { %v2122_v27 = vmax.f32 %v2106_v7, 0.0 }
 0x60d   : > { %2139 = vst.msk [vmem:[%s3207_s19 + $0x58] sm:$0xff] %vm446_vm2, %v2123_v5 }
 0x60e   : > { %2138 = vst.msk [vmem:[%s3207_s19 + $0x50] sm:$0xff] %vm446_vm2, %v2122_v27 }
 0x627   : > { %v2528_v35 = vpop.f32.mrb[12].mxu1 }
 0x628   : > { %v2083_v56 = vadd.f32 %v2528_v35, %v3703_v22  ;;  %v2077_v1 = vpop.f32.mrb[13].mxu1 }
 0x629   : > { %v2078_v46 = vadd.f32 %v3703_v22, %v2077_v1 }
 0x62a   : > { %v2109_v55 = vadd.f32 %v2083_v56, %v3160_v15 }
 0x62b   : > { %v2108_v11 = vadd.f32 %v2078_v46, %v3146_v13 }
 0x62c   : > { %v2125_v37 = vmax.f32 %v2109_v55, 0.0 }
 0x62d   : > { %v2124_v9 = vmax.f32 %v2108_v11, 0.0 }
 0x62e   : > { %2141 = vst.msk [vmem:[%s3207_s19 + $0x68] sm:$0xff] %vm446_vm2, %v2125_v37 }
 0x62f   : > { %2140 = vst.msk [vmem:[%s3207_s19 + $0x60] sm:$0xff] %vm446_vm2, %v2124_v9 }
 0x634   : > { %v2531_v2 = vpop.f32.mrb[14].mxu1 }
 0x635   : > { %v2093_v39 = vadd.f32 %v2531_v2, %v3703_v22  ;;  %v2087_v47 = vpop.f32.mrb[15].mxu1 }
 0x636   : > { %v2088_v15 = vadd.f32 %v3703_v22, %v2087_v47 }
 0x637   : > { %v2111_v13 = vadd.f32 %v2093_v39, %v3180_v19 }
 0x638   : > { %v2110_v61 = vadd.f32 %v2088_v15, %v3166_v17 }
 0x639   : > { %v2127_v28 = vmax.f32 %v2111_v13, 0.0 }
 0x63a   : > { %v2126_v20 = vmax.f32 %v2110_v61, 0.0 }
 0x63b   : > { %2143 = vst.msk [vmem:[%s3207_s19 + $0x78] sm:$0xff] %vm446_vm2, %v2127_v28 }
 0x63c   : > { %2142 = vst.msk [vmem:[%s3207_s19 + $0x70] sm:$0xff] %vm446_vm2, %v2126_v20 }
 0x63d   : > { %2722 = shalt.err (!%p2719_p11)
}
 0x63e   : > { %s2723_s19 = scalar_lea.hbm %s3771_s9, 2048  ;;  %s2727_s18 = scalar_lea.hbm %s3869_s24, 8192 }
 0x63f   : > { %p2724_p1 = scmp.ne.s32.totalorder %s3771_s9, %s2723_s19  ;;  %p2728_p8 = scmp.lt.u32.totalorder %s3771_s9, %s3869_s24 }
 0x640   : > { %p2729_p0 = scmp.lt.u32.totalorder %s2727_s18, %s2723_s19  ;;  %p2731_p4 = scmp.lt.u32.totalorder %s2723_s19, %s3771_s9 }
 0x641   : > { %p2725_p3 = pnand %p2724_p1, %p3870_p13 }
 0x642   : > { %p2730_p2 = por %p2729_p0, %p2728_p8 }
 0x643   : > { %p2726_p5 = pneg %p2725_p3 }
 0x644   : > { %p2732_p6 = por %p2731_p4, %p2730_p2 }
 0x646   : > { %p2733_p7 = pnand %p2732_p6, %p2726_p5 }
 0x648   : > { %2736 = shalt.err (!%p2733_p7)
}
 0x649   : > { %s2827_s20 = smov 128  }
 0x64a   : > { %2558 = dma.vmem_to_hbm [thread:$0]  (%p3870_p13), %s3773_s21, 2048, %s3771_s9, %s2145_s26, %s2827_s20, %s2827_s20, %s2818_s27  }
 0x64b PF: > { %s3871_s14 = sld [smem:[#allocation12_spill]]  ;;  %s3872_s30 = sld [smem:[#allocation17_spill]] }
 0x64c   : > { %p2572_p9 = scmp.ge.s32.totalorder %s2811_s12, 2 }
 0x651   : > { %s2176_s16 = sand.u32 1, %s3871_s14   ;;  %p3873_p12 = scmp.ne.s32.totalorder %s3872_s30, 0 }
 0x652   : > { %s2177_s17 = scalar_lea.sflag [#allocation5], %s2176_s16 }
 0x653   : > { %p2568_p10 = pnand %p2572_p9, %p3873_p12 }
 0x655   : > { %2778 = dma.done.wait (!%p2568_p10), %s2177_s17, 2048  }
 0x656   : > { %2780 = vsyncadd (!%p2568_p10), %s2177_s17, 4294965248  ;;  %s27_s12 = sadd.s32 1, %s2811_s12   ;;  %s3874_s25 = sld [smem:[#allocation13_spill]] }
 0x657   : > { %p24_p11 = scmp.ge.s32.totalorder %s27_s12, 6   ;;  %s3875_s29 = sld [smem:[#allocation18_spill]] }
 0x658   : > { %s3876_s8 = sld [smem:[#allocation14_spill]]  ;;  %s3877_s21 = sld [smem:[#allocation15_spill]] }
 0x659   : > { %s3878_s27 = smov %s2787_s28  ;;  %s3880_s30 = smov %s2803_s10 }
 0x65a   : > { %s3881_s9 = smov %s2807_s11  ;;  %26 = sbr.rel (!%p24_p11) target bundleno = 12 (0xc), region = 122 }
 0x65c   : > { %s3879_s28 = smov %s3874_s25 }
 0x65e   : > { %s3882_s10 = smov %s3876_s8  ;;  %s3883_s11 = smov %s3877_s21 }
 0x661   :  { %2182 = vsyncpa [#allocation4], 1 }
 0x662   :  { %2184 = vsyncpa [#allocation4 + $0x1], 1 }
 0x663   :  { %2185 = vsyncpa [#allocation7], 1 }
 0x664   :  { %2187 = vsyncpa [#allocation7 + $0x1], 1 }
 0x665   :  { %2188 = vsyncpa [#allocation5], 1 }
 0x666   :  { %2190 = vsyncpa [#allocation5 + $0x1], 1 }

</bundles_post_ra>
